<compile_context>
chip_gen: v7x
topology: tpu7x:2x2x1
jax: 0.10.0
libtpu: 0.0.40
codegen_flags: <defaults>
</compile_context>

<pallas_src>
import functools

import jax
import jax.numpy as jnp
from jax.experimental import pallas as pl
from jax.experimental.pallas import tpu as pltpu

# ---- "args" mirroring the PyTorch module config (small, synthetic) ----------
HIDDEN = 32            # args.hidden_size  (out_features_channels)
IMAGE_SIZE = 16        # args.image_size
DIVISIONS = 2          # args.divisions
IN_FEATS = 64          # args.h_w_wheels_joints_size
CONV_OUT = 4 * (1 if DIVISIONS == 1 else 2 ** DIVISIONS)   # 16
BN_EPS = 1e-5


# ----------------------- single fused forward kernel -------------------------
def _rgbd_fused_kernel(x_ref, lw_ref, lb_ref, alpha_ref, bmat_ref, cbrow_ref,
                       o_ref, apad_ref, *, N, H, W, Cin, Cout):
    """Linear(+BN folded) -> PReLU -> reflect-pad -> 3x3 conv -> tanh -> (x+1)/2.

    x_ref    : (N, Fin)
    lw_ref   : (H+2, Fin, (W+2)*Cin)   BN-folded, NHWC-ordered, reflect-padded
    lb_ref   : (H+2, 1,  (W+2)*Cin)
    alpha_ref: (1, 1)                  PReLU parameter
    bmat_ref : (3, (W+2)*Cin, W*Cout)  width-direction block-Toeplitz conv weight
    cbrow_ref: (1, W*Cout)             conv bias tiled over w
    o_ref    : (N*H, W*Cout)           lane-dense output (last dim = 128)
    apad_ref : VMEM scratch (N, H+2, (W+2)*Cin)
    """
    x = x_ref[...]
    alpha = alpha_ref[0, 0]
    k_lanes = (W + 2) * Cin

    # --- Linear (BN already folded) + PReLU, one reflect-padded NHWC row per hp ---
    for hp in range(H + 2):                                   # static unroll (10)
        row = (jnp.dot(x, lw_ref[hp], preferred_element_type=jnp.float32)
               + lb_ref[hp])                                  # (N, (W+2)*Cin)
        apad_ref[:, hp, :] = jnp.where(row > 0.0, row, alpha * row)
    # Dropout: eval mode -> identity.

    # --- 3x3 conv: width taps folded into bmat, 3 row-tap MXU matmuls (K=320) ---
    apad = apad_ref[...]                                      # (N, H+2, (W+2)*Cin)
    acc = cbrow_ref[...]                                      # (1, W*Cout) broadcast
    for dy in range(3):
        tap = apad[:, dy:dy + H, :].reshape(N * H, k_lanes)   # merge leading dims
        acc = acc + jnp.dot(tap, bmat_ref[dy],
                            preferred_element_type=jnp.float32)

    # --- Tanh -> (x+1)/2, full-width (128-lane) store ---
    o_ref[...] = ((jnp.tanh(acc) + 1.0) * 0.5).astype(o_ref.dtype)


def _fused_forward(x, lw_pad, lb_pad, alpha, bmat, cbrow, *, N, H, W, Cin, Cout):
    kern = functools.partial(_rgbd_fused_kernel, N=N, H=H, W=W, Cin=Cin, Cout=Cout)
    return pl.pallas_call(
        kern,
        out_shape=jax.ShapeDtypeStruct((N * H, W * Cout), jnp.float32),
        grid=(1,),
        in_specs=[
            pl.BlockSpec(x.shape, lambda i: (0, 0)),
            pl.BlockSpec(lw_pad.shape, lambda i: (0, 0, 0)),
            pl.BlockSpec(lb_pad.shape, lambda i: (0, 0, 0)),
            pl.BlockSpec((1, 1), lambda i: (0, 0)),
            pl.BlockSpec(bmat.shape, lambda i: (0, 0, 0)),
            pl.BlockSpec((1, W * Cout), lambda i: (0, 0)),
        ],
        out_specs=pl.BlockSpec((N * H, W * Cout), lambda i: (0, 0)),
        scratch_shapes=[pltpu.VMEM((N, H + 2, (W + 2) * Cin), jnp.float32)],
        compiler_params=pltpu.CompilerParams(
            dimension_semantics=("arbitrary",),
            vmem_limit_bytes=16 * 1024 * 1024,    # working set ~3-4 MiB with dbl-buf
        ),
    )(x, lw_pad, lb_pad, alpha, bmat, cbrow)


# ------------------------------- Forward --------------------------------------
def rgbd_out_forward(h_w_wheels_joints, params):
    E, S, Fin = h_w_wheels_joints.shape
    N = E * S
    Hs = Ws = IMAGE_SIZE // DIVISIONS
    r = DIVISIONS
    C = HIDDEN
    Cout = CONV_OUT

    # model_start 'lin': flatten (episodes, steps) into the batch dim.
    x = h_w_wheels_joints.reshape(N, Fin)

    # ---------- trace-time parameter folding (tiny tensors, weights only) ----------
    # BatchNorm2d (eval) as per-channel affine -> fold into the Linear.
    scale = params["bn_gamma"] / jnp.sqrt(params["bn_var"] + BN_EPS)         # (C,)
    shift = params["bn_beta"] - params["bn_mean"] * scale                    # (C,)

    # Linear weight columns are in torch (c, h, w) order.
    w4 = params["lin_w"].reshape(Fin, C, Hs, Ws) * scale[None, :, None, None]
    b4 = (params["lin_b"].reshape(C, Hs, Ws) * scale[:, None, None]
          + shift[:, None, None])
    # -> NHWC column order, then reflect-pad H/W by 1 directly on the weights
    #    (a reflected output value == output of the reflected weight column, and
    #    the later PReLU is elementwise, so this is exact).
    w4 = jnp.transpose(w4, (0, 2, 3, 1))                                     # (Fin,H,W,C)
    b4 = jnp.transpose(b4, (1, 2, 0))                                        # (H,W,C)
    w4 = jnp.pad(w4, ((0, 0), (1, 1), (1, 1), (0, 0)), mode="reflect")
    b4 = jnp.pad(b4, ((1, 1), (1, 1), (0, 0)), mode="reflect")
    lw_pad = jnp.transpose(w4, (1, 0, 2, 3)).reshape(Hs + 2, Fin, (Ws + 2) * C)
    lb_pad = b4.reshape(Hs + 2, 1, (Ws + 2) * C)

    # 3x3 conv: fold the width taps into a block-Toeplitz weight
    #   bmat[dy, wp*C + c, w*Cout + co] = conv_w[dy, wp-w, c, co] for wp-w in {0,1,2}.
    conv_w = params["conv_w"]                                                # (3,3,C,Cout)
    b5 = jnp.zeros((3, Ws + 2, Ws, C, Cout), jnp.float32)
    w_idx = jnp.arange(Ws)
    for dx in range(3):
        b5 = b5.at[:, w_idx + dx, w_idx].set(conv_w[:, dx][:, None])
    bmat = jnp.transpose(b5, (0, 1, 3, 2, 4)).reshape(3, (Ws + 2) * C, Ws * Cout)
    cbrow = jnp.tile(params["conv_b"], Ws).reshape(1, Ws * Cout)
    alpha = params["prelu_alpha"].reshape(1, 1)

    # -------- single fused kernel: Linear+BN+PReLU+pad+Conv3x3+Tanh+(x+1)/2 --------
    out = _fused_forward(x, lw_pad, lb_pad, alpha, bmat, cbrow,
                         N=N, H=Hs, W=Ws, Cin=C, Cout=Cout)      # (N*Hs, Ws*Cout)

    # PixelShuffle(r) + NHWC -> NCHW: pure permutation of a 16 KB tensor (XLA).
    c4 = Cout // (r * r)                                         # = 4
    y = out.reshape(N, Hs, Ws, c4, r, r)
    y = jnp.transpose(y, (0, 3, 1, 4, 2, 5)).reshape(N, c4, Hs * r, Ws * r)

    # model_end 'cnn': restore (episodes, steps, C, H, W).
    return y.reshape(E, S, c4, Hs * r, Ws * r)


# --------------------------- pure-JAX reference --------------------------------
def _reference_forward(h_w_wheels_joints, params):
    E, S, Fin = h_w_wheels_joints.shape
    N = E * S
    Hs = Ws = IMAGE_SIZE // DIVISIONS
    r = DIVISIONS
    x = h_w_wheels_joints.reshape(N, Fin)
    a = x @ params["lin_w"] + params["lin_b"]
    a = a.reshape(N, HIDDEN, Hs, Ws)
    scale = params["bn_gamma"] / jnp.sqrt(params["bn_var"] + BN_EPS)
    shift = params["bn_beta"] - params["bn_mean"] * scale
    a = a * scale[None, :, None, None] + shift[None, :, None, None]
    a = jnp.where(a > 0, a, params["prelu_alpha"] * a)
    a = jnp.transpose(a, (0, 2, 3, 1))
    a = jnp.pad(a, ((0, 0), (1, 1), (1, 1), (0, 0)), mode="reflect")
    y = jax.lax.conv_general_dilated(a, params["conv_w"], (1, 1), "VALID",
                                     dimension_numbers=("NHWC", "HWIO", "NHWC"))
    y = y + params["conv_b"]
    c4 = CONV_OUT // (r * r)
    y = y.reshape(N, Hs, Ws, c4, r, r)
    y = jnp.transpose(y, (0, 3, 1, 4, 2, 5)).reshape(N, c4, Hs * r, Ws * r)
    y = (jnp.tanh(y) + 1.0) * 0.5
    return y.reshape(E, S, c4, Hs * r, Ws * r)


# ------------------------------- Main ------------------------------------------
if __name__ == "__main__":
    key = jax.random.PRNGKey(0)
    k_in, k_lw, k_lb, k_cw, k_cb = jax.random.split(key, 5)

    episodes, steps = 2, 2
    fout = HIDDEN * (IMAGE_SIZE // DIVISIONS) * (IMAGE_SIZE // DIVISIONS)

    params = {
        "lin_w": jax.random.normal(k_lw, (IN_FEATS, fout), jnp.float32) * 0.02,
        "lin_b": jax.random.normal(k_lb, (fout,), jnp.float32) * 0.01,
        "bn_gamma": jnp.ones((HIDDEN,), jnp.float32),
        "bn_beta": jnp.zeros((HIDDEN,), jnp.float32),
        "bn_mean": jnp.zeros((HIDDEN,), jnp.float32),
        "bn_var": jnp.ones((HIDDEN,), jnp.float32),
        "prelu_alpha": jnp.array(0.25, jnp.float32),
        "conv_w": jax.random.normal(k_cw, (3, 3, HIDDEN, CONV_OUT), jnp.float32)
                  * (1.0 / (3.0 * jnp.sqrt(float(HIDDEN)))),
        "conv_b": jax.random.normal(k_cb, (CONV_OUT,), jnp.float32) * 0.01,
    }

    h_w_wheels_joints = jax.random.normal(
        k_in, (episodes, steps, IN_FEATS), jnp.float32)

    rgbd = jax.jit(rgbd_out_forward)(h_w_wheels_joints, params)
    rgbd = jax.block_until_ready(rgbd)

    assert rgbd.shape == (episodes, steps, 4, IMAGE_SIZE, IMAGE_SIZE), rgbd.shape
    assert bool(jnp.all(jnp.isfinite(rgbd)))
    assert bool(jnp.all((rgbd >= 0.0) & (rgbd <= 1.0)))        # (tanh+1)/2 range

    ref = jax.block_until_ready(jax.jit(_reference_forward)(h_w_wheels_joints, params))
    max_err = float(jnp.max(jnp.abs(rgbd - ref)))
    assert max_err < 2e-3, f"max abs error vs reference: {max_err}"

    print("KERNEL_OK")
</pallas_src>

<mosaic_0001>
module attributes {stable_mosaic.version = 11 : i64} {
  func.func @_rgbd_fused_kernel(%arg0: i32, %arg1: memref<4x64xf32, #tpu.memory_space<vmem>>, %arg2: memref<10x64x320xf32, #tpu.memory_space<vmem>>, %arg3: memref<10x1x320xf32, #tpu.memory_space<vmem>>, %arg4: memref<1x1xf32, #tpu.memory_space<vmem>>, %arg5: memref<3x320x128xf32, #tpu.memory_space<vmem>>, %arg6: memref<1x128xf32, #tpu.memory_space<vmem>>, %arg7: memref<32x128xf32, #tpu.memory_space<vmem>>, %arg8: memref<4x10x320xf32, #tpu.memory_space<vmem>>) attributes {dimension_semantics = [#tpu.dimension_semantics<arbitrary>], iteration_bounds = array<i64: 1>, scalar_prefetch = 0 : i64, scratch_operands = 1 : i64, tpu.core_type = #tpu.core_type<tc>, window_params = [{pipeline_mode = #tpu.pipeline_mode<synchronous>, transform_indices = @transform_0, window_bounds = array<i64: 4, 64>}, {pipeline_mode = #tpu.pipeline_mode<synchronous>, transform_indices = @transform_1, window_bounds = array<i64: 10, 64, 320>}, {pipeline_mode = #tpu.pipeline_mode<synchronous>, transform_indices = @transform_2, window_bounds = array<i64: 10, 1, 320>}, {pipeline_mode = #tpu.pipeline_mode<synchronous>, transform_indices = @transform_3, window_bounds = array<i64: 1, 1>}, {pipeline_mode = #tpu.pipeline_mode<synchronous>, transform_indices = @transform_4, window_bounds = array<i64: 3, 320, 128>}, {pipeline_mode = #tpu.pipeline_mode<synchronous>, transform_indices = @transform_5, window_bounds = array<i64: 1, 128>}, {pipeline_mode = #tpu.pipeline_mode<synchronous>, transform_indices = @transform_6, window_bounds = array<i64: 32, 128>}]} {
    %c0 = arith.constant 0 : index
    %c0_0 = arith.constant 0 : index
    %0 = vector.load %arg1[%c0, %c0_0] : memref<4x64xf32, #tpu.memory_space<vmem>>, vector<4x64xf32>
    %c0_1 = arith.constant 0 : index
    %c0_2 = arith.constant 0 : index
    %1 = vector.load %arg4[%c0_1, %c0_2] : memref<1x1xf32, #tpu.memory_space<vmem>>, vector<1x1xf32>
    %2 = vector.extract %1[0, 0] : f32 from vector<1x1xf32>
    %c0_3 = arith.constant 0 : index
    %c0_4 = arith.constant 0 : index
    %c0_5 = arith.constant 0 : index
    %3 = vector.load %arg2[%c0_3, %c0_4, %c0_5] : memref<10x64x320xf32, #tpu.memory_space<vmem>>, vector<1x64x320xf32>
    %4 = vector.shape_cast %3 : vector<1x64x320xf32> to vector<64x320xf32>
    %cst = arith.constant dense<0.000000e+00> : vector<4x320xf32>
    %5 = tpu.matmul %0, %4, %cst {dimension_numbers = #tpu.dot_dimension_numbers<[1], [0], [0], [1], [0, 0, 1, 1], [], []>} : vector<4x64xf32>, vector<64x320xf32>, vector<4x320xf32> -> vector<4x320xf32>
    %c0_6 = arith.constant 0 : index
    %c0_7 = arith.constant 0 : index
    %c0_8 = arith.constant 0 : index
    %6 = vector.load %arg3[%c0_6, %c0_7, %c0_8] : memref<10x1x320xf32, #tpu.memory_space<vmem>>, vector<1x1x320xf32>
    %7 = vector.shape_cast %6 : vector<1x1x320xf32> to vector<1x320xf32>
    %8 = vector.broadcast %7 : vector<1x320xf32> to vector<4x320xf32>
    %9 = arith.addf %5, %8 : vector<4x320xf32>
    %cst_9 = arith.constant 0.000000e+00 : f32
    %10 = vector.broadcast %cst_9 : f32 to vector<4x320xf32>
    %11 = arith.cmpf ogt, %9, %10 : vector<4x320xf32>
    %12 = vector.broadcast %2 : f32 to vector<4x320xf32>
    %13 = arith.mulf %12, %9 : vector<4x320xf32>
    %14 = arith.select %11, %9, %13 : vector<4x320xi1>, vector<4x320xf32>
    %c0_10 = arith.constant 0 : index
    %c0_11 = arith.constant 0 : index
    %c0_12 = arith.constant 0 : index
    %15 = vector.load %arg8[%c0_10, %c0_11, %c0_12] : memref<4x10x320xf32, #tpu.memory_space<vmem>>, vector<4x1x320xf32>
    %16 = vector.shape_cast %15 : vector<4x1x320xf32> to vector<4x320xf32>
    %17 = vector.shape_cast %14 : vector<4x320xf32> to vector<4x1x320xf32>
    tpu.vector_store %arg8[%c0_10, %c0_11, %c0_12], %17 {strides = array<i32>} : memref<4x10x320xf32, #tpu.memory_space<vmem>>, vector<4x1x320xf32>,
    %c1 = arith.constant 1 : index
    %c0_13 = arith.constant 0 : index
    %c0_14 = arith.constant 0 : index
    %18 = vector.load %arg2[%c1, %c0_13, %c0_14] : memref<10x64x320xf32, #tpu.memory_space<vmem>>, vector<1x64x320xf32>
    %19 = vector.shape_cast %18 : vector<1x64x320xf32> to vector<64x320xf32>
    %cst_15 = arith.constant dense<0.000000e+00> : vector<4x320xf32>
    %20 = tpu.matmul %0, %19, %cst_15 {dimension_numbers = #tpu.dot_dimension_numbers<[1], [0], [0], [1], [0, 0, 1, 1], [], []>} : vector<4x64xf32>, vector<64x320xf32>, vector<4x320xf32> -> vector<4x320xf32>
    %c1_16 = arith.constant 1 : index
    %c0_17 = arith.constant 0 : index
    %c0_18 = arith.constant 0 : index
    %21 = vector.load %arg3[%c1_16, %c0_17, %c0_18] : memref<10x1x320xf32, #tpu.memory_space<vmem>>, vector<1x1x320xf32>
    %22 = vector.shape_cast %21 : vector<1x1x320xf32> to vector<1x320xf32>
    %23 = vector.broadcast %22 : vector<1x320xf32> to vector<4x320xf32>
    %24 = arith.addf %20, %23 : vector<4x320xf32>
    %cst_19 = arith.constant 0.000000e+00 : f32
    %25 = vector.broadcast %cst_19 : f32 to vector<4x320xf32>
    %26 = arith.cmpf ogt, %24, %25 : vector<4x320xf32>
    %27 = vector.broadcast %2 : f32 to vector<4x320xf32>
    %28 = arith.mulf %27, %24 : vector<4x320xf32>
    %29 = arith.select %26, %24, %28 : vector<4x320xi1>, vector<4x320xf32>
    %c0_20 = arith.constant 0 : index
    %c1_21 = arith.constant 1 : index
    %c0_22 = arith.constant 0 : index
    %30 = vector.load %arg8[%c0_20, %c1_21, %c0_22] : memref<4x10x320xf32, #tpu.memory_space<vmem>>, vector<4x1x320xf32>
    %31 = vector.shape_cast %30 : vector<4x1x320xf32> to vector<4x320xf32>
    %32 = vector.shape_cast %29 : vector<4x320xf32> to vector<4x1x320xf32>
    tpu.vector_store %arg8[%c0_20, %c1_21, %c0_22], %32 {strides = array<i32>} : memref<4x10x320xf32, #tpu.memory_space<vmem>>, vector<4x1x320xf32>,
    %c2 = arith.constant 2 : index
    %c0_23 = arith.constant 0 : index
    %c0_24 = arith.constant 0 : index
    %33 = vector.load %arg2[%c2, %c0_23, %c0_24] : memref<10x64x320xf32, #tpu.memory_space<vmem>>, vector<1x64x320xf32>
    %34 = vector.shape_cast %33 : vector<1x64x320xf32> to vector<64x320xf32>
    %cst_25 = arith.constant dense<0.000000e+00> : vector<4x320xf32>
    %35 = tpu.matmul %0, %34, %cst_25 {dimension_numbers = #tpu.dot_dimension_numbers<[1], [0], [0], [1], [0, 0, 1, 1], [], []>} : vector<4x64xf32>, vector<64x320xf32>, vector<4x320xf32> -> vector<4x320xf32>
    %c2_26 = arith.constant 2 : index
    %c0_27 = arith.constant 0 : index
    %c0_28 = arith.constant 0 : index
    %36 = vector.load %arg3[%c2_26, %c0_27, %c0_28] : memref<10x1x320xf32, #tpu.memory_space<vmem>>, vector<1x1x320xf32>
    %37 = vector.shape_cast %36 : vector<1x1x320xf32> to vector<1x320xf32>
    %38 = vector.broadcast %37 : vector<1x320xf32> to vector<4x320xf32>
    %39 = arith.addf %35, %38 : vector<4x320xf32>
    %cst_29 = arith.constant 0.000000e+00 : f32
    %40 = vector.broadcast %cst_29 : f32 to vector<4x320xf32>
    %41 = arith.cmpf ogt, %39, %40 : vector<4x320xf32>
    %42 = vector.broadcast %2 : f32 to vector<4x320xf32>
    %43 = arith.mulf %42, %39 : vector<4x320xf32>
    %44 = arith.select %41, %39, %43 : vector<4x320xi1>, vector<4x320xf32>
    %c0_30 = arith.constant 0 : index
    %c2_31 = arith.constant 2 : index
    %c0_32 = arith.constant 0 : index
    %45 = vector.load %arg8[%c0_30, %c2_31, %c0_32] : memref<4x10x320xf32, #tpu.memory_space<vmem>>, vector<4x1x320xf32>
    %46 = vector.shape_cast %45 : vector<4x1x320xf32> to vector<4x320xf32>
    %47 = vector.shape_cast %44 : vector<4x320xf32> to vector<4x1x320xf32>
    tpu.vector_store %arg8[%c0_30, %c2_31, %c0_32], %47 {strides = array<i32>} : memref<4x10x320xf32, #tpu.memory_space<vmem>>, vector<4x1x320xf32>,
    %c3 = arith.constant 3 : index
    %c0_33 = arith.constant 0 : index
    %c0_34 = arith.constant 0 : index
    %48 = vector.load %arg2[%c3, %c0_33, %c0_34] : memref<10x64x320xf32, #tpu.memory_space<vmem>>, vector<1x64x320xf32>
    %49 = vector.shape_cast %48 : vector<1x64x320xf32> to vector<64x320xf32>
    %cst_35 = arith.constant dense<0.000000e+00> : vector<4x320xf32>
    %50 = tpu.matmul %0, %49, %cst_35 {dimension_numbers = #tpu.dot_dimension_numbers<[1], [0], [0], [1], [0, 0, 1, 1], [], []>} : vector<4x64xf32>, vector<64x320xf32>, vector<4x320xf32> -> vector<4x320xf32>
    %c3_36 = arith.constant 3 : index
    %c0_37 = arith.constant 0 : index
    %c0_38 = arith.constant 0 : index
    %51 = vector.load %arg3[%c3_36, %c0_37, %c0_38] : memref<10x1x320xf32, #tpu.memory_space<vmem>>, vector<1x1x320xf32>
    %52 = vector.shape_cast %51 : vector<1x1x320xf32> to vector<1x320xf32>
    %53 = vector.broadcast %52 : vector<1x320xf32> to vector<4x320xf32>
    %54 = arith.addf %50, %53 : vector<4x320xf32>
    %cst_39 = arith.constant 0.000000e+00 : f32
    %55 = vector.broadcast %cst_39 : f32 to vector<4x320xf32>
    %56 = arith.cmpf ogt, %54, %55 : vector<4x320xf32>
    %57 = vector.broadcast %2 : f32 to vector<4x320xf32>
    %58 = arith.mulf %57, %54 : vector<4x320xf32>
    %59 = arith.select %56, %54, %58 : vector<4x320xi1>, vector<4x320xf32>
    %c0_40 = arith.constant 0 : index
    %c3_41 = arith.constant 3 : index
    %c0_42 = arith.constant 0 : index
    %60 = vector.load %arg8[%c0_40, %c3_41, %c0_42] : memref<4x10x320xf32, #tpu.memory_space<vmem>>, vector<4x1x320xf32>
    %61 = vector.shape_cast %60 : vector<4x1x320xf32> to vector<4x320xf32>
    %62 = vector.shape_cast %59 : vector<4x320xf32> to vector<4x1x320xf32>
    tpu.vector_store %arg8[%c0_40, %c3_41, %c0_42], %62 {strides = array<i32>} : memref<4x10x320xf32, #tpu.memory_space<vmem>>, vector<4x1x320xf32>,
    %c4 = arith.constant 4 : index
    %c0_43 = arith.constant 0 : index
    %c0_44 = arith.constant 0 : index
    %63 = vector.load %arg2[%c4, %c0_43, %c0_44] : memref<10x64x320xf32, #tpu.memory_space<vmem>>, vector<1x64x320xf32>
    %64 = vector.shape_cast %63 : vector<1x64x320xf32> to vector<64x320xf32>
    %cst_45 = arith.constant dense<0.000000e+00> : vector<4x320xf32>
    %65 = tpu.matmul %0, %64, %cst_45 {dimension_numbers = #tpu.dot_dimension_numbers<[1], [0], [0], [1], [0, 0, 1, 1], [], []>} : vector<4x64xf32>, vector<64x320xf32>, vector<4x320xf32> -> vector<4x320xf32>
    %c4_46 = arith.constant 4 : index
    %c0_47 = arith.constant 0 : index
    %c0_48 = arith.constant 0 : index
    %66 = vector.load %arg3[%c4_46, %c0_47, %c0_48] : memref<10x1x320xf32, #tpu.memory_space<vmem>>, vector<1x1x320xf32>
    %67 = vector.shape_cast %66 : vector<1x1x320xf32> to vector<1x320xf32>
    %68 = vector.broadcast %67 : vector<1x320xf32> to vector<4x320xf32>
    %69 = arith.addf %65, %68 : vector<4x320xf32>
    %cst_49 = arith.constant 0.000000e+00 : f32
    %70 = vector.broadcast %cst_49 : f32 to vector<4x320xf32>
    %71 = arith.cmpf ogt, %69, %70 : vector<4x320xf32>
    %72 = vector.broadcast %2 : f32 to vector<4x320xf32>
    %73 = arith.mulf %72, %69 : vector<4x320xf32>
    %74 = arith.select %71, %69, %73 : vector<4x320xi1>, vector<4x320xf32>
    %c0_50 = arith.constant 0 : index
    %c4_51 = arith.constant 4 : index
    %c0_52 = arith.constant 0 : index
    %75 = vector.load %arg8[%c0_50, %c4_51, %c0_52] : memref<4x10x320xf32, #tpu.memory_space<vmem>>, vector<4x1x320xf32>
    %76 = vector.shape_cast %75 : vector<4x1x320xf32> to vector<4x320xf32>
    %77 = vector.shape_cast %74 : vector<4x320xf32> to vector<4x1x320xf32>
    tpu.vector_store %arg8[%c0_50, %c4_51, %c0_52], %77 {strides = array<i32>} : memref<4x10x320xf32, #tpu.memory_space<vmem>>, vector<4x1x320xf32>,
    %c5 = arith.constant 5 : index
    %c0_53 = arith.constant 0 : index
    %c0_54 = arith.constant 0 : index
    %78 = vector.load %arg2[%c5, %c0_53, %c0_54] : memref<10x64x320xf32, #tpu.memory_space<vmem>>, vector<1x64x320xf32>
    %79 = vector.shape_cast %78 : vector<1x64x320xf32> to vector<64x320xf32>
    %cst_55 = arith.constant dense<0.000000e+00> : vector<4x320xf32>
    %80 = tpu.matmul %0, %79, %cst_55 {dimension_numbers = #tpu.dot_dimension_numbers<[1], [0], [0], [1], [0, 0, 1, 1], [], []>} : vector<4x64xf32>, vector<64x320xf32>, vector<4x320xf32> -> vector<4x320xf32>
    %c5_56 = arith.constant 5 : index
    %c0_57 = arith.constant 0 : index
    %c0_58 = arith.constant 0 : index
    %81 = vector.load %arg3[%c5_56, %c0_57, %c0_58] : memref<10x1x320xf32, #tpu.memory_space<vmem>>, vector<1x1x320xf32>
    %82 = vector.shape_cast %81 : vector<1x1x320xf32> to vector<1x320xf32>
    %83 = vector.broadcast %82 : vector<1x320xf32> to vector<4x320xf32>
    %84 = arith.addf %80, %83 : vector<4x320xf32>
    %cst_59 = arith.constant 0.000000e+00 : f32
    %85 = vector.broadcast %cst_59 : f32 to vector<4x320xf32>
    %86 = arith.cmpf ogt, %84, %85 : vector<4x320xf32>
    %87 = vector.broadcast %2 : f32 to vector<4x320xf32>
    %88 = arith.mulf %87, %84 : vector<4x320xf32>
    %89 = arith.select %86, %84, %88 : vector<4x320xi1>, vector<4x320xf32>
    %c0_60 = arith.constant 0 : index
    %c5_61 = arith.constant 5 : index
    %c0_62 = arith.constant 0 : index
    %90 = vector.load %arg8[%c0_60, %c5_61, %c0_62] : memref<4x10x320xf32, #tpu.memory_space<vmem>>, vector<4x1x320xf32>
    %91 = vector.shape_cast %90 : vector<4x1x320xf32> to vector<4x320xf32>
    %92 = vector.shape_cast %89 : vector<4x320xf32> to vector<4x1x320xf32>
    tpu.vector_store %arg8[%c0_60, %c5_61, %c0_62], %92 {strides = array<i32>} : memref<4x10x320xf32, #tpu.memory_space<vmem>>, vector<4x1x320xf32>,
    %c6 = arith.constant 6 : index
    %c0_63 = arith.constant 0 : index
    %c0_64 = arith.constant 0 : index
    %93 = vector.load %arg2[%c6, %c0_63, %c0_64] : memref<10x64x320xf32, #tpu.memory_space<vmem>>, vector<1x64x320xf32>
    %94 = vector.shape_cast %93 : vector<1x64x320xf32> to vector<64x320xf32>
    %cst_65 = arith.constant dense<0.000000e+00> : vector<4x320xf32>
    %95 = tpu.matmul %0, %94, %cst_65 {dimension_numbers = #tpu.dot_dimension_numbers<[1], [0], [0], [1], [0, 0, 1, 1], [], []>} : vector<4x64xf32>, vector<64x320xf32>, vector<4x320xf32> -> vector<4x320xf32>
    %c6_66 = arith.constant 6 : index
    %c0_67 = arith.constant 0 : index
    %c0_68 = arith.constant 0 : index
    %96 = vector.load %arg3[%c6_66, %c0_67, %c0_68] : memref<10x1x320xf32, #tpu.memory_space<vmem>>, vector<1x1x320xf32>
    %97 = vector.shape_cast %96 : vector<1x1x320xf32> to vector<1x320xf32>
    %98 = vector.broadcast %97 : vector<1x320xf32> to vector<4x320xf32>
    %99 = arith.addf %95, %98 : vector<4x320xf32>
    %cst_69 = arith.constant 0.000000e+00 : f32
    %100 = vector.broadcast %cst_69 : f32 to vector<4x320xf32>
    %101 = arith.cmpf ogt, %99, %100 : vector<4x320xf32>
    %102 = vector.broadcast %2 : f32 to vector<4x320xf32>
    %103 = arith.mulf %102, %99 : vector<4x320xf32>
    %104 = arith.select %101, %99, %103 : vector<4x320xi1>, vector<4x320xf32>
    %c0_70 = arith.constant 0 : index
    %c6_71 = arith.constant 6 : index
    %c0_72 = arith.constant 0 : index
    %105 = vector.load %arg8[%c0_70, %c6_71, %c0_72] : memref<4x10x320xf32, #tpu.memory_space<vmem>>, vector<4x1x320xf32>
    %106 = vector.shape_cast %105 : vector<4x1x320xf32> to vector<4x320xf32>
    %107 = vector.shape_cast %104 : vector<4x320xf32> to vector<4x1x320xf32>
    tpu.vector_store %arg8[%c0_70, %c6_71, %c0_72], %107 {strides = array<i32>} : memref<4x10x320xf32, #tpu.memory_space<vmem>>, vector<4x1x320xf32>,
    %c7 = arith.constant 7 : index
    %c0_73 = arith.constant 0 : index
    %c0_74 = arith.constant 0 : index
    %108 = vector.load %arg2[%c7, %c0_73, %c0_74] : memref<10x64x320xf32, #tpu.memory_space<vmem>>, vector<1x64x320xf32>
    %109 = vector.shape_cast %108 : vector<1x64x320xf32> to vector<64x320xf32>
    %cst_75 = arith.constant dense<0.000000e+00> : vector<4x320xf32>
    %110 = tpu.matmul %0, %109, %cst_75 {dimension_numbers = #tpu.dot_dimension_numbers<[1], [0], [0], [1], [0, 0, 1, 1], [], []>} : vector<4x64xf32>, vector<64x320xf32>, vector<4x320xf32> -> vector<4x320xf32>
    %c7_76 = arith.constant 7 : index
    %c0_77 = arith.constant 0 : index
    %c0_78 = arith.constant 0 : index
    %111 = vector.load %arg3[%c7_76, %c0_77, %c0_78] : memref<10x1x320xf32, #tpu.memory_space<vmem>>, vector<1x1x320xf32>
    %112 = vector.shape_cast %111 : vector<1x1x320xf32> to vector<1x320xf32>
    %113 = vector.broadcast %112 : vector<1x320xf32> to vector<4x320xf32>
    %114 = arith.addf %110, %113 : vector<4x320xf32>
    %cst_79 = arith.constant 0.000000e+00 : f32
    %115 = vector.broadcast %cst_79 : f32 to vector<4x320xf32>
    %116 = arith.cmpf ogt, %114, %115 : vector<4x320xf32>
    %117 = vector.broadcast %2 : f32 to vector<4x320xf32>
    %118 = arith.mulf %117, %114 : vector<4x320xf32>
    %119 = arith.select %116, %114, %118 : vector<4x320xi1>, vector<4x320xf32>
    %c0_80 = arith.constant 0 : index
    %c7_81 = arith.constant 7 : index
    %c0_82 = arith.constant 0 : index
    %120 = vector.load %arg8[%c0_80, %c7_81, %c0_82] : memref<4x10x320xf32, #tpu.memory_space<vmem>>, vector<4x1x320xf32>
    %121 = vector.shape_cast %120 : vector<4x1x320xf32> to vector<4x320xf32>
    %122 = vector.shape_cast %119 : vector<4x320xf32> to vector<4x1x320xf32>
    tpu.vector_store %arg8[%c0_80, %c7_81, %c0_82], %122 {strides = array<i32>} : memref<4x10x320xf32, #tpu.memory_space<vmem>>, vector<4x1x320xf32>,
    %c8 = arith.constant 8 : index
    %c0_83 = arith.constant 0 : index
    %c0_84 = arith.constant 0 : index
    %123 = vector.load %arg2[%c8, %c0_83, %c0_84] : memref<10x64x320xf32, #tpu.memory_space<vmem>>, vector<1x64x320xf32>
    %124 = vector.shape_cast %123 : vector<1x64x320xf32> to vector<64x320xf32>
    %cst_85 = arith.constant dense<0.000000e+00> : vector<4x320xf32>
    %125 = tpu.matmul %0, %124, %cst_85 {dimension_numbers = #tpu.dot_dimension_numbers<[1], [0], [0], [1], [0, 0, 1, 1], [], []>} : vector<4x64xf32>, vector<64x320xf32>, vector<4x320xf32> -> vector<4x320xf32>
    %c8_86 = arith.constant 8 : index
    %c0_87 = arith.constant 0 : index
    %c0_88 = arith.constant 0 : index
    %126 = vector.load %arg3[%c8_86, %c0_87, %c0_88] : memref<10x1x320xf32, #tpu.memory_space<vmem>>, vector<1x1x320xf32>
    %127 = vector.shape_cast %126 : vector<1x1x320xf32> to vector<1x320xf32>
    %128 = vector.broadcast %127 : vector<1x320xf32> to vector<4x320xf32>
    %129 = arith.addf %125, %128 : vector<4x320xf32>
    %cst_89 = arith.constant 0.000000e+00 : f32
    %130 = vector.broadcast %cst_89 : f32 to vector<4x320xf32>
    %131 = arith.cmpf ogt, %129, %130 : vector<4x320xf32>
    %132 = vector.broadcast %2 : f32 to vector<4x320xf32>
    %133 = arith.mulf %132, %129 : vector<4x320xf32>
    %134 = arith.select %131, %129, %133 : vector<4x320xi1>, vector<4x320xf32>
    %c0_90 = arith.constant 0 : index
    %c8_91 = arith.constant 8 : index
    %c0_92 = arith.constant 0 : index
    %135 = vector.load %arg8[%c0_90, %c8_91, %c0_92] : memref<4x10x320xf32, #tpu.memory_space<vmem>>, vector<4x1x320xf32>
    %136 = vector.shape_cast %135 : vector<4x1x320xf32> to vector<4x320xf32>
    %137 = vector.shape_cast %134 : vector<4x320xf32> to vector<4x1x320xf32>
    tpu.vector_store %arg8[%c0_90, %c8_91, %c0_92], %137 {strides = array<i32>} : memref<4x10x320xf32, #tpu.memory_space<vmem>>, vector<4x1x320xf32>,
    %c9 = arith.constant 9 : index
    %c0_93 = arith.constant 0 : index
    %c0_94 = arith.constant 0 : index
    %138 = vector.load %arg2[%c9, %c0_93, %c0_94] : memref<10x64x320xf32, #tpu.memory_space<vmem>>, vector<1x64x320xf32>
    %139 = vector.shape_cast %138 : vector<1x64x320xf32> to vector<64x320xf32>
    %cst_95 = arith.constant dense<0.000000e+00> : vector<4x320xf32>
    %140 = tpu.matmul %0, %139, %cst_95 {dimension_numbers = #tpu.dot_dimension_numbers<[1], [0], [0], [1], [0, 0, 1, 1], [], []>} : vector<4x64xf32>, vector<64x320xf32>, vector<4x320xf32> -> vector<4x320xf32>
    %c9_96 = arith.constant 9 : index
    %c0_97 = arith.constant 0 : index
    %c0_98 = arith.constant 0 : index
    %141 = vector.load %arg3[%c9_96, %c0_97, %c0_98] : memref<10x1x320xf32, #tpu.memory_space<vmem>>, vector<1x1x320xf32>
    %142 = vector.shape_cast %141 : vector<1x1x320xf32> to vector<1x320xf32>
    %143 = vector.broadcast %142 : vector<1x320xf32> to vector<4x320xf32>
    %144 = arith.addf %140, %143 : vector<4x320xf32>
    %cst_99 = arith.constant 0.000000e+00 : f32
    %145 = vector.broadcast %cst_99 : f32 to vector<4x320xf32>
    %146 = arith.cmpf ogt, %144, %145 : vector<4x320xf32>
    %147 = vector.broadcast %2 : f32 to vector<4x320xf32>
    %148 = arith.mulf %147, %144 : vector<4x320xf32>
    %149 = arith.select %146, %144, %148 : vector<4x320xi1>, vector<4x320xf32>
    %c0_100 = arith.constant 0 : index
    %c9_101 = arith.constant 9 : index
    %c0_102 = arith.constant 0 : index
    %150 = vector.load %arg8[%c0_100, %c9_101, %c0_102] : memref<4x10x320xf32, #tpu.memory_space<vmem>>, vector<4x1x320xf32>
    %151 = vector.shape_cast %150 : vector<4x1x320xf32> to vector<4x320xf32>
    %152 = vector.shape_cast %149 : vector<4x320xf32> to vector<4x1x320xf32>
    tpu.vector_store %arg8[%c0_100, %c9_101, %c0_102], %152 {strides = array<i32>} : memref<4x10x320xf32, #tpu.memory_space<vmem>>, vector<4x1x320xf32>,
    %c0_103 = arith.constant 0 : index
    %c0_104 = arith.constant 0 : index
    %c0_105 = arith.constant 0 : index
    %153 = vector.load %arg8[%c0_103, %c0_104, %c0_105] : memref<4x10x320xf32, #tpu.memory_space<vmem>>, vector<4x10x320xf32>
    %c0_106 = arith.constant 0 : index
    %c0_107 = arith.constant 0 : index
    %154 = vector.load %arg6[%c0_106, %c0_107] : memref<1x128xf32, #tpu.memory_space<vmem>>, vector<1x128xf32>
    %155 = vector.extract_strided_slice %153 {offsets = [0, 0, 0], sizes = [4, 8, 320], strides = [1, 1, 1]} : vector<4x10x320xf32> to vector<4x8x320xf32>
    %156 = vector.shape_cast %155 : vector<4x8x320xf32> to vector<32x320xf32>
    %c0_108 = arith.constant 0 : index
    %c0_109 = arith.constant 0 : index
    %c0_110 = arith.constant 0 : index
    %157 = vector.load %arg5[%c0_108, %c0_109, %c0_110] : memref<3x320x128xf32, #tpu.memory_space<vmem>>, vector<1x320x128xf32>
    %158 = vector.shape_cast %157 : vector<1x320x128xf32> to vector<320x128xf32>
    %cst_111 = arith.constant dense<0.000000e+00> : vector<32x128xf32>
    %159 = tpu.matmul %156, %158, %cst_111 {dimension_numbers = #tpu.dot_dimension_numbers<[1], [0], [0], [1], [0, 0, 1, 1], [], []>} : vector<32x320xf32>, vector<320x128xf32>, vector<32x128xf32> -> vector<32x128xf32>
    %160 = vector.broadcast %154 : vector<1x128xf32> to vector<32x128xf32>
    %161 = arith.addf %160, %159 : vector<32x128xf32>
    %162 = vector.extract_strided_slice %153 {offsets = [0, 1, 0], sizes = [4, 8, 320], strides = [1, 1, 1]} : vector<4x10x320xf32> to vector<4x8x320xf32>
    %163 = vector.shape_cast %162 : vector<4x8x320xf32> to vector<32x320xf32>
    %c1_112 = arith.constant 1 : index
    %c0_113 = arith.constant 0 : index
    %c0_114 = arith.constant 0 : index
    %164 = vector.load %arg5[%c1_112, %c0_113, %c0_114] : memref<3x320x128xf32, #tpu.memory_space<vmem>>, vector<1x320x128xf32>
    %165 = vector.shape_cast %164 : vector<1x320x128xf32> to vector<320x128xf32>
    %cst_115 = arith.constant dense<0.000000e+00> : vector<32x128xf32>
    %166 = tpu.matmul %163, %165, %cst_115 {dimension_numbers = #tpu.dot_dimension_numbers<[1], [0], [0], [1], [0, 0, 1, 1], [], []>} : vector<32x320xf32>, vector<320x128xf32>, vector<32x128xf32> -> vector<32x128xf32>
    %167 = arith.addf %161, %166 : vector<32x128xf32>
    %168 = vector.extract_strided_slice %153 {offsets = [0, 2, 0], sizes = [4, 8, 320], strides = [1, 1, 1]} : vector<4x10x320xf32> to vector<4x8x320xf32>
    %169 = vector.shape_cast %168 : vector<4x8x320xf32> to vector<32x320xf32>
    %c2_116 = arith.constant 2 : index
    %c0_117 = arith.constant 0 : index
    %c0_118 = arith.constant 0 : index
    %170 = vector.load %arg5[%c2_116, %c0_117, %c0_118] : memref<3x320x128xf32, #tpu.memory_space<vmem>>, vector<1x320x128xf32>
    %171 = vector.shape_cast %170 : vector<1x320x128xf32> to vector<320x128xf32>
    %cst_119 = arith.constant dense<0.000000e+00> : vector<32x128xf32>
    %172 = tpu.matmul %169, %171, %cst_119 {dimension_numbers = #tpu.dot_dimension_numbers<[1], [0], [0], [1], [0, 0, 1, 1], [], []>} : vector<32x320xf32>, vector<320x128xf32>, vector<32x128xf32> -> vector<32x128xf32>
    %173 = arith.addf %167, %172 : vector<32x128xf32>
    %174 = math.tanh %173 : vector<32x128xf32>
    %cst_120 = arith.constant 1.000000e+00 : f32
    %175 = vector.broadcast %cst_120 : f32 to vector<32x128xf32>
    %176 = arith.addf %174, %175 : vector<32x128xf32>
    %cst_121 = arith.constant 5.000000e-01 : f32
    %177 = vector.broadcast %cst_121 : f32 to vector<32x128xf32>
    %178 = arith.mulf %176, %177 : vector<32x128xf32>
    %c0_122 = arith.constant 0 : index
    %c0_123 = arith.constant 0 : index
    %179 = vector.load %arg7[%c0_122, %c0_123] : memref<32x128xf32, #tpu.memory_space<vmem>>, vector<32x128xf32>
    tpu.vector_store %arg7[%c0_122, %c0_123], %178 {strides = array<i32>} : memref<32x128xf32, #tpu.memory_space<vmem>>, vector<32x128xf32>,
    return
  }
  func.func @transform_0(%arg0: i32) -> (i32, i32) {
    %c0_i32 = arith.constant 0 : i32
    %c0_i32_0 = arith.constant 0 : i32
    %c0_i32_1 = arith.constant 0 : i32
    return %c0_i32, %c0_i32_0 : i32, i32
  }
  func.func @transform_1(%arg0: i32) -> (i32, i32, i32) {
    %c0_i32 = arith.constant 0 : i32
    %c0_i32_0 = arith.constant 0 : i32
    %c0_i32_1 = arith.constant 0 : i32
    %c0_i32_2 = arith.constant 0 : i32
    return %c0_i32, %c0_i32_0, %c0_i32_1 : i32, i32, i32
  }
  func.func @transform_2(%arg0: i32) -> (i32, i32, i32) {
    %c0_i32 = arith.constant 0 : i32
    %c0_i32_0 = arith.constant 0 : i32
    %c0_i32_1 = arith.constant 0 : i32
    %c0_i32_2 = arith.constant 0 : i32
    return %c0_i32, %c0_i32_0, %c0_i32_1 : i32, i32, i32
  }
  func.func @transform_3(%arg0: i32) -> (i32, i32) {
    %c0_i32 = arith.constant 0 : i32
    %c0_i32_0 = arith.constant 0 : i32
    %c0_i32_1 = arith.constant 0 : i32
    return %c0_i32, %c0_i32_0 : i32, i32
  }
  func.func @transform_4(%arg0: i32) -> (i32, i32, i32) {
    %c0_i32 = arith.constant 0 : i32
    %c0_i32_0 = arith.constant 0 : i32
    %c0_i32_1 = arith.constant 0 : i32
    %c0_i32_2 = arith.constant 0 : i32
    return %c0_i32, %c0_i32_0, %c0_i32_1 : i32, i32, i32
  }
  func.func @transform_5(%arg0: i32) -> (i32, i32) {
    %c0_i32 = arith.constant 0 : i32
    %c0_i32_0 = arith.constant 0 : i32
    %c0_i32_1 = arith.constant 0 : i32
    return %c0_i32, %c0_i32_0 : i32, i32
  }
  func.func @transform_6(%arg0: i32) -> (i32, i32) {
    %c0_i32 = arith.constant 0 : i32
    %c0_i32_0 = arith.constant 0 : i32
    %c0_i32_1 = arith.constant 0 : i32
    return %c0_i32, %c0_i32_0 : i32, i32
  }
}

</mosaic_0001>

<bundles_post_ra>
// kernel: tile.8
= control target key start
LH: loop header
LB: loop body
LE: loop exit
PB: predicated region body
PF: predicated region fallthrough
CT: control target
= control target key end

     0   :  { %s22_s0 = inlined_call_operand.vmem [shape: f32[16], index: 0, kind: input, shape index: {}]   ;;  %s23_s1 = inlined_call_operand.vmem [shape: f32[8,16], index: 1, kind: output, shape index: {}]  }
   0x1   :  { %v4_v0 = vld [vmem:[%s22_s0] ss:$0 sm:$0xff] }
   0x2   :  { %5 = vst [vmem:[%s23_s1] sm:$0xff] %v4_v0 }

// kernel: tile.9
= control target key start
LH: loop header
LB: loop body
LE: loop exit
PB: predicated region body
PF: predicated region fallthrough
CT: control target
= control target key end

     0   :  { %s67_s10 = smov 112   ;;  %s68_s11 = smov 80   ;;  %vm3_vm0 = vcmask 130048   ;;  %vm9_vm1 = vcmask 1048448   ;;  %vm15_vm2 = vcmask 917248   ;;  %vm21_vm3 = vcmask 786048   ;;  %s111_s0 = inlined_call_operand.vmem [shape: f32[8,16], index: 0, kind: input, shape index: {}]   ;;  %s112_s1 = inlined_call_operand.vmem [shape: f32[1,128], index: 1, kind: output, shape index: {}]  }
   0x1   :  { %v53_v0 = vld [vmem:[%s111_s0 + $0x7] sm:$0x1]   ;;  %v55_v1 = vld [vmem:[%s111_s0 + $0x5] sm:$0x1]   ;;  %v54_v2 = vld [vmem:[%s111_s0 + $0x6] sm:$0x1]  }
   0x2   :  { %7 = vrot.lane.b32.xlu0 %v53_v0, %s67_s10  ;;  %19 = vrot.lane.b32.xlu1 %v55_v1, %s68_s11  ;;  %v56_v3 = vld [vmem:[%s111_s0 + $0x4] sm:$0x1]   ;;  %v2_v4 = vld [vmem:[%s111_s0] sm:$0x1]   ;;  %s69_s18 = smov 96   ;;  %s70_s19 = smov 64  }
   0x3   :  { %4 = vst.msk [vmem:[#allocation0] sm:$0x1] %vm3_vm0, %v2_v4   ;;  %v57_v5 = vld [vmem:[%s111_s0 + $0x3] sm:$0x1]   ;;  %v58_v6 = vld [vmem:[%s111_s0 + $0x2] sm:$0x1]  }
   0x4   :  { %s71_s24 = smov 48   ;;  %s72_s25 = smov 32   ;;  %v59_v7 = vld [vmem:[%s111_s0 + $0x1] sm:$0x1]   ;;  %vm27_vm4 = vcmask 654848   ;;  %vm33_vm5 = vcmask 523648  }
   0x5   :  { %s73_s0 = smov 16   ;;  %vm39_vm6 = vcmask 392448   ;;  %vm45_vm7 = vcmask 261248  }
   0x6   :  { %13 = vrot.lane.b32.xlu0 %v54_v2, %s69_s18  ;;  %25 = vrot.lane.b32.xlu1 %v56_v3, %s70_s19 }
   0xa   :  { %31 = vrot.lane.b32.xlu0 %v57_v5, %s71_s24  ;;  %37 = vrot.lane.b32.xlu1 %v58_v6, %s72_s25 }
   0xe   :  { %43 = vrot.lane.b32.xlu0 %v59_v7, %s73_s0 }
  0x74   :  { %v8_v8 = vpop.permute.xlu0 %7   ;;  %v20_v9 = vpop.permute.xlu1 %19  }
  0x75   :  { %10 = vst.msk [vmem:[#allocation0] sm:$0x1] %vm9_vm1, %v8_v8  }
  0x78   :  { %v14_v10 = vpop.permute.xlu0 %13   ;;  %v26_v11 = vpop.permute.xlu1 %25  }
  0x79   :  { %16 = vst.msk [vmem:[#allocation0] sm:$0x1] %vm15_vm2, %v14_v10  }
  0x7a   :  { %22 = vst.msk [vmem:[#allocation0] sm:$0x1] %vm21_vm3, %v20_v9  }
  0x7b   :  { %28 = vst.msk [vmem:[#allocation0] sm:$0x1] %vm27_vm4, %v26_v11  }
  0x7c   :  { %v32_v12 = vpop.permute.xlu0 %31   ;;  %v38_v13 = vpop.permute.xlu1 %37  }
  0x7d   :  { %34 = vst.msk [vmem:[#allocation0] sm:$0x1] %vm33_vm5, %v32_v12  }
  0x7e   :  { %40 = vst.msk [vmem:[#allocation0] sm:$0x1] %vm39_vm6, %v38_v13  }
  0x80   :  { %v44_v14 = vpop.permute.xlu0 %43  }
  0x81   :  { %46 = vst.msk [vmem:[#allocation0] sm:$0x1] %vm45_vm7, %v44_v14  }
  0x88   :  { %v50_v15 = vld [vmem:[#allocation0] sm:$0x1] }
  0x89   :  { %52 = vst [vmem:[%s112_s1] sm:$0x1] %v50_v15 }

// kernel: rgbd_out_forward.1
= control target key start
LH: loop header
LB: loop body
LE: loop exit
PB: predicated region body
PF: predicated region fallthrough
CT: control target
= control target key end

     0   :  { %v4639_v0 = vmov 0.0|0.0   ;;  %v4640_v4 = vmov 0.0   ;;  %vm4641_vm0 = vmmov 0   ;;  %vm69_vm1 = vcmask 523264   ;;  %s6256_s1 = inlined_call_operand.vmem [shape: f32[10,64,320], index: 1, kind: input, shape index: {}]   ;;  %s6257_s0 = inlined_call_operand.vmem [shape: f32[4,64], index: 0, kind: input, shape index: {}]   ;;  %s6258_s3 = inlined_call_operand.<no memory space> [shape: f32[1,1], index: 3, kind: input, shape index: {}]   ;;  %s6259_s4 = inlined_call_operand.vmem [shape: f32[3,320,128], index: 4, kind: input, shape index: {}]   ;;  %s6260_s2 = inlined_call_operand.vmem [shape: f32[10,1,320], index: 2, kind: input, shape index: {}]   ;;  %s6261_s5 = inlined_call_operand.vmem [shape: f32[1,128], index: 5, kind: input, shape index: {}]   ;;  %s6262_s6 = inlined_call_operand.vmem [shape: f32[32,128], index: 6, kind: output, shape index: {}]  }
   0x1   :  { %4185 = vmatprep.subr.bf16.mxu1 %v4639_v0  ;;  %v29_v1 = vld [vmem:[%s6256_s1 + $0x8] sm:$0xff]  ;;  %v32_v2 = vld [vmem:[%s6256_s1 + $0x20] sm:$0xff]  ;;  %v30_v3 = vld [vmem:[%s6256_s1 + $0x10] sm:$0xff]  ;;  %137 = vmatprep.mubr.f32.mxu0 %v4640_v4 }
   0x2   :  { %v4169_v5 = vpack.c.bf16 %v32_v2, %v29_v1  ;;  %v33_v6 = vld [vmem:[%s6256_s1 + $0x28] sm:$0xff]  ;;  %v28_v7 = vld [vmem:[%s6256_s1] sm:$0xff]  ;;  %v31_v8 = vld [vmem:[%s6256_s1 + $0x18] sm:$0xff]  ;;  %3929 = vmatprep.mubr.msk.f32.mxu1 %vm4641_vm0, %v4640_v4 }
   0x3   :  { %v4186_v9 = vpack.c.bf16 %v33_v6, %v30_v3  ;;  %v4171_v10 = vpack.c.bf16 %v31_v8, %v28_v7  ;;  %v35_v11 = vld [vmem:[%s6256_s1 + $0x38] sm:$0xff]  ;;  %v38_v12 = vld [vmem:[%s6256_s1 + $0x50] sm:$0xff]  ;;  %v36_v13 = vld [vmem:[%s6256_s1 + $0x40] sm:$0xff] }
   0x4   :  { %4170 = vmatprep.subr.bf16.mxu0 %v4169_v5  ;;  %v4173_v14 = vpack.c.bf16 %v38_v12, %v35_v11  ;;  %v39_v15 = vld [vmem:[%s6256_s1 + $0x58] sm:$0xff]  ;;  %v34_v16 = vld [vmem:[%s6256_s1 + $0x30] sm:$0xff]  ;;  %v37_v17 = vld [vmem:[%s6256_s1 + $0x48] sm:$0xff] }
   0x5   :  { %4187 = vmatpush3.bf16.msra.mxu1 %v4186_v9  ;;  %4172 = vmatpush1.bf16.msra.mxu0 %v4171_v10  ;;  %v4189_v18 = vpack.c.bf16 %v39_v15, %v36_v13  ;;  %v4175_v19 = vpack.c.bf16 %v37_v17, %v34_v16  ;;  %v41_v20 = vld [vmem:[%s6256_s1 + $0x68] sm:$0xff]  ;;  %v44_v21 = vld [vmem:[%s6256_s1 + $0x80] sm:$0xff]  ;;  %v42_v22 = vld [vmem:[%s6256_s1 + $0x70] sm:$0xff] }
   0x6   :  { %4188 = vmatprep.subr.bf16.mxu1 %v4639_v0  ;;  %4174 = vmatprep.subr.bf16.mxu0 %v4173_v14  ;;  %v4177_v23 = vpack.c.bf16 %v44_v21, %v41_v20  ;;  %v45_v24 = vld [vmem:[%s6256_s1 + $0x88] sm:$0xff]  ;;  %v40_v25 = vld [vmem:[%s6256_s1 + $0x60] sm:$0xff]  ;;  %v43_v26 = vld [vmem:[%s6256_s1 + $0x78] sm:$0xff] }
   0x7   :  { %v47_v27 = vld [vmem:[%s6256_s1 + $0x98] sm:$0xff]  ;;  %v50_v28 = vld [vmem:[%s6256_s1 + $0xb0] sm:$0xff]  ;;  %v4192_v29 = vpack.c.bf16 %v45_v24, %v42_v22  ;;  %v4179_v30 = vpack.c.bf16 %v43_v26, %v40_v25  ;;  %v48_v31 = vld [vmem:[%s6256_s1 + $0xa0] sm:$0xff] }
   0x8   :  { %v4181_v32 = vpack.c.bf16 %v50_v28, %v47_v27  ;;  %v51_v33 = vld [vmem:[%s6256_s1 + $0xb8] sm:$0xff]  ;;  %v46_v34 = vld [vmem:[%s6256_s1 + $0x90] sm:$0xff]  ;;  %v49_v35 = vld [vmem:[%s6256_s1 + $0xa8] sm:$0xff] }
   0x9   :  { %4190 = vmatpush3.bf16.msra.mxu1 %v4189_v18  ;;  %4176 = vmatpush1.bf16.msra.mxu0 %v4175_v19  ;;  %v3320_v36 = vld [vmem:[%s6256_s1 + $0xc8] sm:$0xff]  ;;  %v3323_v37 = vld [vmem:[%s6256_s1 + $0xe0] sm:$0xff]  ;;  %v4195_v38 = vpack.c.bf16 %v51_v33, %v48_v31  ;;  %v4183_v39 = vpack.c.bf16 %v49_v35, %v46_v34  ;;  %v3321_v40 = vld [vmem:[%s6256_s1 + $0xd0] sm:$0xff]  ;;  %v11_v34 = vstv %s6258_s3 }
   0xa   :  { %4191 = vmatprep.subr.bf16.mxu1 %v4639_v0  ;;  %4178 = vmatprep.subr.bf16.mxu0 %v4177_v23  ;;  %v4197_v41 = vpack.c.bf16 %v3323_v37, %v3320_v36  ;;  %v3324_v42 = vld [vmem:[%s6256_s1 + $0xe8] sm:$0xff]  ;;  %v3319_v43 = vld [vmem:[%s6256_s1 + $0xc0] sm:$0xff]  ;;  %v3322_v44 = vld [vmem:[%s6256_s1 + $0xd8] sm:$0xff]  ;;  %12 = vst [vmem:[#allocation3] sm:$0x1] %v11_v34 }
   0xb   :  { %v3326_v45 = vld [vmem:[%s6256_s1 + $0xf8] sm:$0xff]  ;;  %v3329_v46 = vld [vmem:[%s6256_s1 + $0x110] sm:$0xff]  ;;  %v4784_v47 = vld [vmem:[%s6257_s0] sm:$0xf]  ;;  %v4214_v48 = vpack.c.bf16 %v3324_v42, %v3321_v40  ;;  %v4199_v49 = vpack.c.bf16 %v3322_v44, %v3319_v43 }
   0xc   :  { %v3327_v50 = vld [vmem:[%s6256_s1 + $0x100] sm:$0xff]  ;;  %v4201_v51 = vpack.c.bf16 %v3329_v46, %v3326_v45  ;;  %v3330_v52 = vld [vmem:[%s6256_s1 + $0x118] sm:$0xff]  ;;  %v3325_v53 = vld [vmem:[%s6256_s1 + $0xf0] sm:$0xff] }
   0xd   :  { %4193 = vmatpush3.bf16.msra.mxu1 %v4192_v29  ;;  %4180 = vmatpush1.bf16.msra.mxu0 %v4179_v30  ;;  %v3328_v54 = vld [vmem:[%s6256_s1 + $0x108] sm:$0xff]  ;;  %v3335_v56 = vld [vmem:[%s6256_s1 + $0x140] sm:$0xff]  ;;  %v4217_v57 = vpack.c.bf16 %v3330_v52, %v3327_v50  ;;  %v3333_v59 = vld [vmem:[%s6256_s1 + $0x130] sm:$0xff] }
   0xe   :  { %4194 = vmatprep.subr.bf16.mxu1 %v4639_v0  ;;  %4182 = vmatprep.subr.bf16.mxu0 %v4181_v32  ;;  %v3332_v55 = vld [vmem:[%s6256_s1 + $0x128] sm:$0xff]  ;;  %v4203_v58 = vpack.c.bf16 %v3328_v54, %v3325_v53  ;;  %v3331_v62 = vld [vmem:[%s6256_s1 + $0x120] sm:$0xff]  ;;  %v3334_v63 = vld [vmem:[%s6256_s1 + $0x138] sm:$0xff] }
   0xf   :  { %v4205_v60 = vpack.c.bf16 %v3335_v56, %v3332_v55  ;;  %v3336_v61 = vld [vmem:[%s6256_s1 + $0x148] sm:$0xff]  ;;  %v3338_v1 = vld [vmem:[%s6256_s1 + $0x158] sm:$0xff]  ;;  %v3341_v2 = vld [vmem:[%s6256_s1 + $0x170] sm:$0xff]  ;;  %v4207_v5 = vpack.c.bf16 %v3334_v63, %v3331_v62 }
  0x10   :  { %v4220_v3 = vpack.c.bf16 %v3336_v61, %v3333_v59  ;;  %v3339_v6 = vld [vmem:[%s6256_s1 + $0x160] sm:$0xff]  ;;  %v4209_v7 = vpack.c.bf16 %v3341_v2, %v3338_v1  ;;  %v3342_v8 = vld [vmem:[%s6256_s1 + $0x178] sm:$0xff]  ;;  %v3337_v9 = vld [vmem:[%s6256_s1 + $0x150] sm:$0xff] }
  0x11   :  { %4196 = vmatpush3.bf16.msra.mxu1 %v4195_v38  ;;  %4184 = vmatpush1.bf16.msra.mxu0 %v4183_v39  ;;  %v3340_v10 = vld [vmem:[%s6256_s1 + $0x168] sm:$0xff]  ;;  %v3350_v12 = vld [vmem:[%s6256_s1 + $0x1a0] sm:$0xff]  ;;  %v4223_v13 = vpack.c.bf16 %v3342_v8, %v3339_v6  ;;  %v3348_v15 = vld [vmem:[%s6256_s1 + $0x190] sm:$0xff] }
  0x12   :  { %4213 = vmatprep.subr.bf16.mxu1 %v4639_v0  ;;  %4198 = vmatprep.subr.bf16.mxu0 %v4197_v41  ;;  %v3347_v11 = vld [vmem:[%s6256_s1 + $0x188] sm:$0xff]  ;;  %v4211_v14 = vpack.c.bf16 %v3340_v10, %v3337_v9  ;;  %v3346_v18 = vld [vmem:[%s6256_s1 + $0x180] sm:$0xff]  ;;  %v3349_v19 = vld [vmem:[%s6256_s1 + $0x198] sm:$0xff] }
  0x13   :  { %v4225_v16 = vpack.c.bf16 %v3350_v12, %v3347_v11  ;;  %v3351_v17 = vld [vmem:[%s6256_s1 + $0x1a8] sm:$0xff]  ;;  %v3353_v20 = vld [vmem:[%s6256_s1 + $0x1b8] sm:$0xff]  ;;  %v3356_v21 = vld [vmem:[%s6256_s1 + $0x1d0] sm:$0xff]  ;;  %v4227_v23 = vpack.c.bf16 %v3349_v19, %v3346_v18 }
  0x14   :  { %3317 = vmatmul.mubr.msk.f32.vlgmr.msra.gmra.mrb[0].mxu0 %vm69_vm1, %v4784_v47  ;;  %3930 = vmatmul.mubr.msk.f32.vlgmr.msra.gmra.mrb[0].mxu1 %vm69_vm1, %v4784_v47  ;;  %v4242_v22 = vpack.c.bf16 %v3351_v17, %v3348_v15  ;;  %v3354_v24 = vld [vmem:[%s6256_s1 + $0x1c0] sm:$0xff]  ;;  %v4229_v25 = vpack.c.bf16 %v3356_v21, %v3353_v20  ;;  %v3357_v26 = vld [vmem:[%s6256_s1 + $0x1d8] sm:$0xff]  ;;  %v3352_v27 = vld [vmem:[%s6256_s1 + $0x1b0] sm:$0xff] }
  0x15   :  { %4215 = vmatpush3.bf16.msra.mxu1 %v4214_v48  ;;  %4200 = vmatpush1.bf16.msra.mxu0 %v4199_v49  ;;  %v3355_v28 = vld [vmem:[%s6256_s1 + $0x1c8] sm:$0xff]  ;;  %v3362_v30 = vld [vmem:[%s6256_s1 + $0x200] sm:$0xff]  ;;  %v4245_v31 = vpack.c.bf16 %v3357_v26, %v3354_v24  ;;  %v3360_v33 = vld [vmem:[%s6256_s1 + $0x1f0] sm:$0xff] }
  0x16   :  { %4216 = vmatprep.subr.bf16.mxu1 %v4639_v0  ;;  %4202 = vmatprep.subr.bf16.mxu0 %v4201_v51  ;;  %v3359_v29 = vld [vmem:[%s6256_s1 + $0x1e8] sm:$0xff]  ;;  %v4231_v32 = vpack.c.bf16 %v3355_v28, %v3352_v27  ;;  %v3358_v37 = vld [vmem:[%s6256_s1 + $0x1e0] sm:$0xff]  ;;  %v3361_v38 = vld [vmem:[%s6256_s1 + $0x1f8] sm:$0xff] }
  0x17   :  { %386 = vmatprep.mubr.f32.mxu0 %v4640_v4  ;;  %3948 = vmatprep.mubr.msk.f32.mxu1 %vm4641_vm0, %v4640_v4  ;;  %v4233_v35 = vpack.c.bf16 %v3362_v30, %v3359_v29  ;;  %v3363_v36 = vld [vmem:[%s6256_s1 + $0x208] sm:$0xff]  ;;  %v3365_v39 = vld [vmem:[%s6256_s1 + $0x218] sm:$0xff]  ;;  %v3368_v40 = vld [vmem:[%s6256_s1 + $0x230] sm:$0xff]  ;;  %v4235_v42 = vpack.c.bf16 %v3361_v38, %v3358_v37 }
  0x18   :  { %v4248_v41 = vpack.c.bf16 %v3363_v36, %v3360_v33  ;;  %v3366_v43 = vld [vmem:[%s6256_s1 + $0x220] sm:$0xff]  ;;  %v4237_v44 = vpack.c.bf16 %v3368_v40, %v3365_v39  ;;  %v3369_v45 = vld [vmem:[%s6256_s1 + $0x238] sm:$0xff]  ;;  %v3364_v46 = vld [vmem:[%s6256_s1 + $0x210] sm:$0xff] }
  0x19   :  { %4218 = vmatpush3.bf16.msra.mxu1 %v4217_v57  ;;  %4204 = vmatpush1.bf16.msra.mxu0 %v4203_v58  ;;  %v3367_v48 = vld [vmem:[%s6256_s1 + $0x228] sm:$0xff]  ;;  %v3377_v50 = vld [vmem:[%s6256_s1 + $0x260] sm:$0xff]  ;;  %v4251_v51 = vpack.c.bf16 %v3369_v45, %v3366_v43  ;;  %v3375_v53 = vld [vmem:[%s6256_s1 + $0x250] sm:$0xff] }
  0x1a   :  { %4219 = vmatprep.subr.bf16.mxu1 %v4639_v0  ;;  %4206 = vmatprep.subr.bf16.mxu0 %v4205_v60  ;;  %v3374_v49 = vld [vmem:[%s6256_s1 + $0x248] sm:$0xff]  ;;  %v4239_v52 = vpack.c.bf16 %v3367_v48, %v3364_v46  ;;  %v3373_v56 = vld [vmem:[%s6256_s1 + $0x240] sm:$0xff]  ;;  %v3376_v57 = vld [vmem:[%s6256_s1 + $0x258] sm:$0xff] }
  0x1b   :  { %v4253_v54 = vpack.c.bf16 %v3377_v50, %v3374_v49  ;;  %v3378_v55 = vld [vmem:[%s6256_s1 + $0x268] sm:$0xff]  ;;  %v3380_v58 = vld [vmem:[%s6256_s1 + $0x278] sm:$0xff]  ;;  %v3383_v59 = vld [vmem:[%s6256_s1 + $0x290] sm:$0xff]  ;;  %v4255_v61 = vpack.c.bf16 %v3376_v57, %v3373_v56 }
  0x1c   :  { %v4270_v60 = vpack.c.bf16 %v3378_v55, %v3375_v53  ;;  %v3381_v62 = vld [vmem:[%s6256_s1 + $0x280] sm:$0xff]  ;;  %v4257_v63 = vpack.c.bf16 %v3383_v59, %v3380_v58  ;;  %v3384_v1 = vld [vmem:[%s6256_s1 + $0x298] sm:$0xff]  ;;  %v3379_v2 = vld [vmem:[%s6256_s1 + $0x270] sm:$0xff] }
  0x1d   :  { %4221 = vmatpush3.bf16.msra.mxu1 %v4220_v3  ;;  %4208 = vmatpush1.bf16.msra.mxu0 %v4207_v5  ;;  %v3382_v3 = vld [vmem:[%s6256_s1 + $0x288] sm:$0xff]  ;;  %v3389_v6 = vld [vmem:[%s6256_s1 + $0x2c0] sm:$0xff]  ;;  %v3387_v9 = vld [vmem:[%s6256_s1 + $0x2b0] sm:$0xff] }
  0x1e   :  { %4222 = vmatprep.subr.bf16.mxu1 %v4639_v0  ;;  %4210 = vmatprep.subr.bf16.mxu0 %v4209_v7  ;;  %v3386_v5 = vld [vmem:[%s6256_s1 + $0x2a8] sm:$0xff]  ;;  %v4273_v7 = vpack.c.bf16 %v3384_v1, %v3381_v62  ;;  %v4259_v8 = vpack.c.bf16 %v3382_v3, %v3379_v2  ;;  %v3385_v12 = vld [vmem:[%s6256_s1 + $0x2a0] sm:$0xff]  ;;  %v3395_v15 = vld [vmem:[%s6256_s1 + $0x2f0] sm:$0xff] }
  0x1f   :  { %v4261_v10 = vpack.c.bf16 %v3389_v6, %v3386_v5  ;;  %v3390_v11 = vld [vmem:[%s6256_s1 + $0x2c8] sm:$0xff]  ;;  %v3393_v18 = vld [vmem:[%s6256_s1 + $0x2e0] sm:$0xff]  ;;  %v3396_v20 = vld [vmem:[%s6256_s1 + $0x2f8] sm:$0xff] }
  0x20   :  { %v3391_v21 = vld [vmem:[%s6256_s1 + $0x2d0] sm:$0xff]  ;;  %v3404_v24 = vld [vmem:[%s6256_s1 + $0x320] sm:$0xff]  ;;  %v3405_v29 = vld [vmem:[%s6256_s1 + $0x328] sm:$0xff] }
  0x21   :  { %4224 = vmatpush3.bf16.msra.mxu1 %v4223_v13  ;;  %4212 = vmatpush1.bf16.msra.mxu0 %v4211_v14  ;;  %v3388_v13 = vld [vmem:[%s6256_s1 + $0x2b8] sm:$0xff]  ;;  %v3402_v27 = vld [vmem:[%s6256_s1 + $0x310] sm:$0xff]  ;;  %v3400_v30 = vld [vmem:[%s6256_s1 + $0x300] sm:$0xff] }
  0x22   :  { %4241 = vmatprep.subr.bf16.mxu1 %v4639_v0  ;;  %4226 = vmatprep.subr.bf16.mxu0 %v4225_v16  ;;  %v3392_v14 = vld [vmem:[%s6256_s1 + $0x2d8] sm:$0xff]  ;;  %v4276_v16 = vpack.c.bf16 %v3390_v11, %v3387_v9  ;;  %v4263_v17 = vpack.c.bf16 %v3388_v13, %v3385_v12  ;;  %v3410_v33 = vld [vmem:[%s6256_s1 + $0x350] sm:$0xff]  ;;  %v4298_v34 = vpack.c.bf16 %v3405_v29, %v3402_v27  ;;  %v3408_v36 = vld [vmem:[%s6256_s1 + $0x340] sm:$0xff] }
  0x23   :  { %v4265_v19 = vpack.c.bf16 %v3395_v15, %v3392_v14  ;;  %v3411_v38 = vld [vmem:[%s6256_s1 + $0x358] sm:$0xff]  ;;  %v3406_v39 = vld [vmem:[%s6256_s1 + $0x330] sm:$0xff]  ;;  %v3409_v40 = vld [vmem:[%s6256_s1 + $0x348] sm:$0xff] }
  0x24   :  { %3344 = vmatmul.mubr.msk.f32.vlgmr.msra.gmra.mrb[2].mxu0 %vm69_vm1, %v4784_v47  ;;  %3949 = vmatmul.mubr.msk.f32.vlgmr.msra.gmra.mrb[2].mxu1 %vm69_vm1, %v4784_v47  ;;  %v4301_v43 = vpack.c.bf16 %v3411_v38, %v3408_v36  ;;  %v3414_v45 = vld [vmem:[%s6256_s1 + $0x370] sm:$0xff]  ;;  %v3417_v48 = vld [vmem:[%s6256_s1 + $0x388] sm:$0xff]  ;;  %v3412_v49 = vld [vmem:[%s6256_s1 + $0x360] sm:$0xff] }
  0x25   :  { %4243 = vmatpush3.bf16.msra.mxu1 %v4242_v22  ;;  %4228 = vmatpush1.bf16.msra.mxu0 %v4227_v23  ;;  %v3394_v22 = vld [vmem:[%s6256_s1 + $0x2e8] sm:$0xff]  ;;  %v3415_v50 = vld [vmem:[%s6256_s1 + $0x378] sm:$0xff]  ;;  %v4304_v53 = vpack.c.bf16 %v3417_v48, %v3414_v45  ;;  %v3420_v55 = vld [vmem:[%s6256_s1 + $0x3a0] sm:$0xff] }
  0x26   :  { %4244 = vmatprep.subr.bf16.mxu1 %v4639_v0  ;;  %4230 = vmatprep.subr.bf16.mxu0 %v4229_v25  ;;  %v3401_v23 = vld [vmem:[%s6256_s1 + $0x308] sm:$0xff]  ;;  %v4279_v25 = vpack.c.bf16 %v3396_v20, %v3393_v18  ;;  %v4267_v26 = vpack.c.bf16 %v3394_v22, %v3391_v21  ;;  %v3423_v57 = vld [vmem:[%s6256_s1 + $0x3b8] sm:$0xff]  ;;  %v3418_v58 = vld [vmem:[%s6256_s1 + $0x390] sm:$0xff] }
  0x27   :  { %631 = vmatprep.mubr.f32.mxu0 %v4640_v4  ;;  %3967 = vmatprep.mubr.msk.f32.mxu1 %vm4641_vm0, %v4640_v4  ;;  %v4281_v28 = vpack.c.bf16 %v3404_v24, %v3401_v23  ;;  %v3421_v59 = vld [vmem:[%s6256_s1 + $0x3a8] sm:$0xff]  ;;  %v4307_v62 = vpack.c.bf16 %v3423_v57, %v3420_v55  ;;  %v3429_v1 = vld [vmem:[%s6256_s1 + $0x3d0] sm:$0xff]  ;;  %v3427_v5 = vld [vmem:[%s6256_s1 + $0x3c0] sm:$0xff] }
  0x28   :  { %v3432_v3 = vld [vmem:[%s6256_s1 + $0x3e8] sm:$0xff]  ;;  %v3430_v6 = vld [vmem:[%s6256_s1 + $0x3d8] sm:$0xff]  ;;  %v3435_v11 = vld [vmem:[%s6256_s1 + $0x400] sm:$0xff] }
  0x29   :  { %4246 = vmatpush3.bf16.msra.mxu1 %v4245_v31  ;;  %4232 = vmatpush1.bf16.msra.mxu0 %v4231_v32  ;;  %v3403_v31 = vld [vmem:[%s6256_s1 + $0x318] sm:$0xff]  ;;  %v4326_v9 = vpack.c.bf16 %v3432_v3, %v3429_v1  ;;  %v26_v12 = vld [vmem:[#allocation3] sm:$0x1]  ;;  %v3433_v15 = vld [vmem:[%s6256_s1 + $0x3f0] sm:$0xff] }
  0x2a   :  { %4247 = vmatprep.subr.bf16.mxu1 %v4639_v0  ;;  %4234 = vmatprep.subr.bf16.mxu0 %v4233_v35  ;;  %v3407_v32 = vld [vmem:[%s6256_s1 + $0x338] sm:$0xff]  ;;  %v4283_v35 = vpack.c.bf16 %v3403_v31, %v3400_v30  ;;  %4625 = vpush %v26_v12  ;;  %v3443_v18 = vld [vmem:[%s6256_s1 + $0x440] sm:$0xff]  ;;  %v3441_v21 = vld [vmem:[%s6256_s1 + $0x430] sm:$0xff] }
  0x2b   :  { %v4285_v37 = vpack.c.bf16 %v3410_v33, %v3407_v32  ;;  %v3438_v14 = vld [vmem:[%s6256_s1 + $0x418] sm:$0xff]  ;;  %v3444_v23 = vld [vmem:[%s6256_s1 + $0x448] sm:$0xff]  ;;  %v3439_v24 = vld [vmem:[%s6256_s1 + $0x420] sm:$0xff] }
  0x2c   :  { %v3449_v27 = vld [vmem:[%s6256_s1 + $0x470] sm:$0xff]  ;;  %v3447_v30 = vld [vmem:[%s6256_s1 + $0x460] sm:$0xff]  ;;  %v3450_v32 = vld [vmem:[%s6256_s1 + $0x478] sm:$0xff] }
  0x2d   :  { %4249 = vmatpush3.bf16.msra.mxu1 %v4248_v41  ;;  %4236 = vmatpush1.bf16.msra.mxu0 %v4235_v42  ;;  %v3413_v41 = vld [vmem:[%s6256_s1 + $0x368] sm:$0xff]  ;;  %v3416_v42 = vld [vmem:[%s6256_s1 + $0x380] sm:$0xff]  ;;  %v3445_v33 = vld [vmem:[%s6256_s1 + $0x450] sm:$0xff] }
  0x2e   :  { %4250 = vmatprep.subr.bf16.mxu1 %v4639_v0  ;;  %4238 = vmatprep.subr.bf16.mxu0 %v4237_v44  ;;  %v4287_v44 = vpack.c.bf16 %v3409_v40, %v3406_v39  ;;  %v4289_v46 = vpack.c.bf16 %v3416_v42, %v3413_v41  ;;  %v3458_v36 = vld [vmem:[%s6256_s1 + $0x4a0] sm:$0xff]  ;;  %v3456_v39 = vld [vmem:[%s6256_s1 + $0x490] sm:$0xff]  ;;  %v3459_v41 = vld [vmem:[%s6256_s1 + $0x4a8] sm:$0xff] }
  0x2f   :  { %v3454_v42 = vld [vmem:[%s6256_s1 + $0x480] sm:$0xff]  ;;  %v3464_v45 = vld [vmem:[%s6256_s1 + $0x4d0] sm:$0xff] }
  0x30   :  { %v3470_v55 = vld [vmem:[%s6256_s1 + $0x500] sm:$0xff]  ;;  %v3476_v1 = vld [vmem:[%s6256_s1 + $0x530] sm:$0xff] }
  0x31   :  { %4252 = vmatpush3.bf16.msra.mxu1 %v4251_v51  ;;  %4240 = vmatpush1.bf16.msra.mxu0 %v4239_v52  ;;  %v3419_v51 = vld [vmem:[%s6256_s1 + $0x398] sm:$0xff]  ;;  %v3422_v52 = vld [vmem:[%s6256_s1 + $0x3b0] sm:$0xff] }
  0x32   :  { %4269 = vmatprep.subr.bf16.mxu1 %v4639_v0  ;;  %4254 = vmatprep.subr.bf16.mxu0 %v4253_v54  ;;  %v4291_v54 = vpack.c.bf16 %v3415_v50, %v3412_v49  ;;  %v4293_v56 = vpack.c.bf16 %v3422_v52, %v3419_v51  ;;  %v3462_v49 = vld [vmem:[%s6256_s1 + $0x4c0] sm:$0xff]  ;;  %v3465_v51 = vld [vmem:[%s6256_s1 + $0x4d8] sm:$0xff]  ;;  %v3460_v52 = vld [vmem:[%s6256_s1 + $0x4b0] sm:$0xff] }
  0x34   :  { %3371 = vmatmul.mubr.msk.f32.vlgmr.msra.gmra.mrb[4].mxu0 %vm69_vm1, %v4784_v47  ;;  %3968 = vmatmul.mubr.msk.f32.vlgmr.msra.gmra.mrb[4].mxu1 %vm69_vm1, %v4784_v47 }
  0x35   :  { %4271 = vmatpush3.bf16.msra.mxu1 %v4270_v60  ;;  %4256 = vmatpush1.bf16.msra.mxu0 %v4255_v61  ;;  %v3428_v60 = vld [vmem:[%s6256_s1 + $0x3c8] sm:$0xff]  ;;  %v3431_v61 = vld [vmem:[%s6256_s1 + $0x3e0] sm:$0xff] }
  0x36   :  { %4272 = vmatprep.subr.bf16.mxu1 %v4639_v0  ;;  %4258 = vmatprep.subr.bf16.mxu0 %v4257_v63  ;;  %v4295_v63 = vpack.c.bf16 %v3421_v59, %v3418_v58  ;;  %v4309_v2 = vpack.c.bf16 %v3431_v61, %v3428_v60  ;;  %v3468_v58 = vld [vmem:[%s6256_s1 + $0x4f0] sm:$0xff]  ;;  %v3471_v60 = vld [vmem:[%s6256_s1 + $0x508] sm:$0xff]  ;;  %v3466_v61 = vld [vmem:[%s6256_s1 + $0x4e0] sm:$0xff] }
  0x37   :  { %876 = vmatprep.mubr.f32.mxu0 %v4640_v4  ;;  %3986 = vmatprep.mubr.msk.f32.mxu1 %vm4641_vm0, %v4640_v4 }
  0x39   :  { %4274 = vmatpush3.bf16.msra.mxu1 %v4273_v7  ;;  %4260 = vmatpush1.bf16.msra.mxu0 %v4259_v8  ;;  %v3434_v7 = vld [vmem:[%s6256_s1 + $0x3f8] sm:$0xff]  ;;  %v3437_v8 = vld [vmem:[%s6256_s1 + $0x410] sm:$0xff] }
  0x3a   :  { %4275 = vmatprep.subr.bf16.mxu1 %v4639_v0  ;;  %4262 = vmatprep.subr.bf16.mxu0 %v4261_v10  ;;  %v4311_v10 = vpack.c.bf16 %v3430_v6, %v3427_v5  ;;  %v4313_v13 = vpack.c.bf16 %v3437_v8, %v3434_v7  ;;  %v3474_v5 = vld [vmem:[%s6256_s1 + $0x520] sm:$0xff]  ;;  %v3477_v7 = vld [vmem:[%s6256_s1 + $0x538] sm:$0xff]  ;;  %v3472_v8 = vld [vmem:[%s6256_s1 + $0x510] sm:$0xff] }
  0x3b   :  { %v4363_v12 = vpack.c.bf16 %v3477_v7, %v3474_v5  ;;  %v3522_v7 = vld [vmem:[%s6256_s1 + $0x670] sm:$0xff] }
  0x3d   :  { %4277 = vmatpush3.bf16.msra.mxu1 %v4276_v16  ;;  %4264 = vmatpush1.bf16.msra.mxu0 %v4263_v17  ;;  %v3436_v16 = vld [vmem:[%s6256_s1 + $0x408] sm:$0xff] }
  0x3e   :  { %4278 = vmatprep.subr.bf16.mxu1 %v4639_v0  ;;  %4266 = vmatprep.subr.bf16.mxu0 %v4265_v19  ;;  %v3440_v17 = vld [vmem:[%s6256_s1 + $0x428] sm:$0xff]  ;;  %v4329_v19 = vpack.c.bf16 %v3438_v14, %v3435_v11  ;;  %v4315_v20 = vpack.c.bf16 %v3436_v16, %v3433_v15  ;;  %v3485_v11 = vld [vmem:[%s6256_s1 + $0x560] sm:$0xff]  ;;  %v3483_v14 = vld [vmem:[%s6256_s1 + $0x550] sm:$0xff] }
  0x3f   :  { %v4317_v22 = vpack.c.bf16 %v3443_v18, %v3440_v17  ;;  %v3486_v16 = vld [vmem:[%s6256_s1 + $0x568] sm:$0xff]  ;;  %v3481_v17 = vld [vmem:[%s6256_s1 + $0x540] sm:$0xff]  ;;  %v3484_v18 = vld [vmem:[%s6256_s1 + $0x558] sm:$0xff] }
  0x41   :  { %4280 = vmatpush3.bf16.msra.mxu1 %v4279_v25  ;;  %4268 = vmatpush1.bf16.msra.mxu0 %v4267_v26  ;;  %v3442_v25 = vld [vmem:[%s6256_s1 + $0x438] sm:$0xff] }
  0x42   :  { %4297 = vmatprep.subr.bf16.mxu1 %v4639_v0  ;;  %4282 = vmatprep.subr.bf16.mxu0 %v4281_v28  ;;  %v3446_v26 = vld [vmem:[%s6256_s1 + $0x458] sm:$0xff]  ;;  %v4332_v28 = vpack.c.bf16 %v3444_v23, %v3441_v21  ;;  %v4319_v29 = vpack.c.bf16 %v3442_v25, %v3439_v24  ;;  %v4382_v21 = vpack.c.bf16 %v3486_v16, %v3483_v14  ;;  %v3489_v23 = vld [vmem:[%s6256_s1 + $0x580] sm:$0xff] }
  0x43   :  { %v4321_v31 = vpack.c.bf16 %v3449_v27, %v3446_v26  ;;  %v3492_v25 = vld [vmem:[%s6256_s1 + $0x598] sm:$0xff]  ;;  %v3487_v26 = vld [vmem:[%s6256_s1 + $0x570] sm:$0xff]  ;;  %v3490_v27 = vld [vmem:[%s6256_s1 + $0x588] sm:$0xff] }
  0x44   :  { %3398 = vmatmul.mubr.msk.f32.vlgmr.msra.gmra.mrb[6].mxu0 %vm69_vm1, %v4784_v47  ;;  %3987 = vmatmul.mubr.msk.f32.vlgmr.msra.gmra.mrb[6].mxu1 %vm69_vm1, %v4784_v47  ;;  %v3528_v16 = vld [vmem:[%s6256_s1 + $0x6a0] sm:$0xff] }
  0x45   :  { %4299 = vmatpush3.bf16.msra.mxu1 %v4298_v34  ;;  %4284 = vmatpush1.bf16.msra.mxu0 %v4283_v35  ;;  %v3448_v34 = vld [vmem:[%s6256_s1 + $0x468] sm:$0xff] }
  0x46   :  { %4300 = vmatprep.subr.bf16.mxu1 %v4639_v0  ;;  %4286 = vmatprep.subr.bf16.mxu0 %v4285_v37  ;;  %v3455_v35 = vld [vmem:[%s6256_s1 + $0x488] sm:$0xff]  ;;  %v4335_v37 = vpack.c.bf16 %v3450_v32, %v3447_v30  ;;  %v4323_v38 = vpack.c.bf16 %v3448_v34, %v3445_v33  ;;  %v4385_v30 = vpack.c.bf16 %v3492_v25, %v3489_v23  ;;  %v3495_v32 = vld [vmem:[%s6256_s1 + $0x5b0] sm:$0xff] }
  0x47   :  { %1121 = vmatprep.mubr.f32.mxu0 %v4640_v4  ;;  %4005 = vmatprep.mubr.msk.f32.mxu1 %vm4641_vm0, %v4640_v4  ;;  %v4337_v40 = vpack.c.bf16 %v3458_v36, %v3455_v35  ;;  %v3498_v34 = vld [vmem:[%s6256_s1 + $0x5c8] sm:$0xff]  ;;  %v3493_v35 = vld [vmem:[%s6256_s1 + $0x5a0] sm:$0xff]  ;;  %v3496_v36 = vld [vmem:[%s6256_s1 + $0x5b8] sm:$0xff] }
  0x48   :  { %v3537_v25 = vld [vmem:[%s6256_s1 + $0x6d0] sm:$0xff] }
  0x49   :  { %4302 = vmatpush3.bf16.msra.mxu1 %v4301_v43  ;;  %4288 = vmatpush1.bf16.msra.mxu0 %v4287_v44  ;;  %v3457_v43 = vld [vmem:[%s6256_s1 + $0x498] sm:$0xff] }
  0x4a   :  { %4303 = vmatprep.subr.bf16.mxu1 %v4639_v0  ;;  %4290 = vmatprep.subr.bf16.mxu0 %v4289_v46  ;;  %v3461_v44 = vld [vmem:[%s6256_s1 + $0x4b8] sm:$0xff]  ;;  %v4354_v46 = vpack.c.bf16 %v3459_v41, %v3456_v39  ;;  %v4339_v48 = vpack.c.bf16 %v3457_v43, %v3454_v42  ;;  %v4388_v39 = vpack.c.bf16 %v3498_v34, %v3495_v32  ;;  %v3501_v41 = vld [vmem:[%s6256_s1 + $0x5e0] sm:$0xff] }
  0x4b   :  { %v4341_v50 = vpack.c.bf16 %v3464_v45, %v3461_v44  ;;  %v3504_v43 = vld [vmem:[%s6256_s1 + $0x5f8] sm:$0xff]  ;;  %v3499_v44 = vld [vmem:[%s6256_s1 + $0x5d0] sm:$0xff]  ;;  %v3502_v45 = vld [vmem:[%s6256_s1 + $0x5e8] sm:$0xff] }
  0x4c   :  { %v3543_v34 = vld [vmem:[%s6256_s1 + $0x700] sm:$0xff] }
  0x4d   :  { %4305 = vmatpush3.bf16.msra.mxu1 %v4304_v53  ;;  %4292 = vmatpush1.bf16.msra.mxu0 %v4291_v54  ;;  %v3463_v53 = vld [vmem:[%s6256_s1 + $0x4c8] sm:$0xff] }
  0x4e   :  { %4306 = vmatprep.subr.bf16.mxu1 %v4639_v0  ;;  %4294 = vmatprep.subr.bf16.mxu0 %v4293_v56  ;;  %v3467_v54 = vld [vmem:[%s6256_s1 + $0x4e8] sm:$0xff]  ;;  %v4357_v56 = vpack.c.bf16 %v3465_v51, %v3462_v49  ;;  %v4343_v57 = vpack.c.bf16 %v3463_v53, %v3460_v52  ;;  %v4391_v49 = vpack.c.bf16 %v3504_v43, %v3501_v41  ;;  %v3510_v51 = vld [vmem:[%s6256_s1 + $0x610] sm:$0xff] }
  0x4f   :  { %v4345_v59 = vpack.c.bf16 %v3470_v55, %v3467_v54  ;;  %v3513_v53 = vld [vmem:[%s6256_s1 + $0x628] sm:$0xff]  ;;  %v3508_v54 = vld [vmem:[%s6256_s1 + $0x600] sm:$0xff]  ;;  %v3511_v55 = vld [vmem:[%s6256_s1 + $0x618] sm:$0xff] }
  0x50   :  { %v3549_v43 = vld [vmem:[%s6256_s1 + $0x730] sm:$0xff] }
  0x51   :  { %4308 = vmatpush3.bf16.msra.mxu1 %v4307_v62  ;;  %4296 = vmatpush1.bf16.msra.mxu0 %v4295_v63  ;;  %v3469_v62 = vld [vmem:[%s6256_s1 + $0x4f8] sm:$0xff] }
  0x52   :  { %4325 = vmatprep.subr.bf16.mxu1 %v4639_v0  ;;  %4310 = vmatprep.subr.bf16.mxu0 %v4309_v2  ;;  %v3473_v63 = vld [vmem:[%s6256_s1 + $0x518] sm:$0xff]  ;;  %v4360_v2 = vpack.c.bf16 %v3471_v60, %v3468_v58  ;;  %v4347_v3 = vpack.c.bf16 %v3469_v62, %v3466_v61  ;;  %v4410_v58 = vpack.c.bf16 %v3513_v53, %v3510_v51  ;;  %v3516_v60 = vld [vmem:[%s6256_s1 + $0x640] sm:$0xff] }
  0x53   :  { %v4349_v6 = vpack.c.bf16 %v3476_v1, %v3473_v63  ;;  %v3519_v62 = vld [vmem:[%s6256_s1 + $0x658] sm:$0xff]  ;;  %v3514_v63 = vld [vmem:[%s6256_s1 + $0x630] sm:$0xff]  ;;  %v3517_v1 = vld [vmem:[%s6256_s1 + $0x648] sm:$0xff] }
  0x54   :  { %3425 = vmatmul.mubr.msk.f32.vlgmr.msra.gmra.mrb[8].mxu0 %vm69_vm1, %v4784_v47  ;;  %4006 = vmatmul.mubr.msk.f32.vlgmr.msra.gmra.mrb[8].mxu1 %vm69_vm1, %v4784_v47  ;;  %v4413_v5 = vpack.c.bf16 %v3519_v62, %v3516_v60  ;;  %v3555_v53 = vld [vmem:[%s6256_s1 + $0x760] sm:$0xff]  ;;  %v2526_v60 = vld [vmem:[%s6259_s4 + $0x88] sm:$0xff] }
  0x55   :  { %4327 = vmatpush3.bf16.msra.mxu1 %v4326_v9  ;;  %4312 = vmatpush1.bf16.msra.mxu0 %v4311_v10  ;;  %v3475_v9 = vld [vmem:[%s6256_s1 + $0x528] sm:$0xff] }
  0x56   :  { %4328 = vmatprep.subr.bf16.mxu1 %v4639_v0  ;;  %4314 = vmatprep.subr.bf16.mxu0 %v4313_v13  ;;  %v3482_v10 = vld [vmem:[%s6256_s1 + $0x548] sm:$0xff]  ;;  %v4351_v13 = vpack.c.bf16 %v3475_v9, %v3472_v8 }
  0x57   :  { %1366 = vmatprep.mubr.f32.mxu0 %v4640_v4  ;;  %4024 = vmatprep.mubr.msk.f32.mxu1 %vm4641_vm0, %v4640_v4  ;;  %v4365_v15 = vpack.c.bf16 %v3485_v11, %v3482_v10  ;;  %v3525_v9 = vld [vmem:[%s6256_s1 + $0x688] sm:$0xff]  ;;  %v3520_v10 = vld [vmem:[%s6256_s1 + $0x660] sm:$0xff]  ;;  %v3523_v11 = vld [vmem:[%s6256_s1 + $0x678] sm:$0xff] }
  0x58   :  { %v4416_v14 = vpack.c.bf16 %v3525_v9, %v3522_v7  ;;  %v2510_v62 = vld [vmem:[%s6259_s4 + $0x8] sm:$0xff]  ;;  %v2529_v7 = vld [vmem:[%s6259_s4 + $0xa0] sm:$0xff] }
  0x59   :  { %4330 = vmatpush3.bf16.msra.mxu1 %v4329_v19  ;;  %4316 = vmatpush1.bf16.msra.mxu0 %v4315_v20  ;;  %v3488_v19 = vld [vmem:[%s6256_s1 + $0x578] sm:$0xff]  ;;  %v3491_v20 = vld [vmem:[%s6256_s1 + $0x590] sm:$0xff] }
  0x5a   :  { %4331 = vmatprep.subr.bf16.mxu1 %v4639_v0  ;;  %4318 = vmatprep.subr.bf16.mxu0 %v4317_v22  ;;  %v4367_v22 = vpack.c.bf16 %v3484_v18, %v3481_v17  ;;  %v4369_v24 = vpack.c.bf16 %v3491_v20, %v3488_v19  ;;  %v3531_v18 = vld [vmem:[%s6256_s1 + $0x6b8] sm:$0xff]  ;;  %v3526_v19 = vld [vmem:[%s6256_s1 + $0x690] sm:$0xff]  ;;  %v3529_v20 = vld [vmem:[%s6256_s1 + $0x6a8] sm:$0xff] }
  0x5b   :  { %v4419_v23 = vpack.c.bf16 %v3531_v18, %v3528_v16  ;;  %v2516_v18 = vld [vmem:[%s6259_s4 + $0x38] sm:$0xff]  ;;  %s4626_s21 = spop %4625 }
  0x5d   :  { %4333 = vmatpush3.bf16.msra.mxu1 %v4332_v28  ;;  %4320 = vmatpush1.bf16.msra.mxu0 %v4319_v29  ;;  %v3494_v28 = vld [vmem:[%s6256_s1 + $0x5a8] sm:$0xff]  ;;  %v3497_v29 = vld [vmem:[%s6256_s1 + $0x5c0] sm:$0xff] }
  0x5e   :  { %4334 = vmatprep.subr.bf16.mxu1 %v4639_v0  ;;  %4322 = vmatprep.subr.bf16.mxu0 %v4321_v31  ;;  %v4371_v31 = vpack.c.bf16 %v3490_v27, %v3487_v26  ;;  %v4373_v33 = vpack.c.bf16 %v3497_v29, %v3494_v28  ;;  %v3540_v27 = vld [vmem:[%s6256_s1 + $0x6e8] sm:$0xff]  ;;  %v3535_v28 = vld [vmem:[%s6256_s1 + $0x6c0] sm:$0xff]  ;;  %v3538_v29 = vld [vmem:[%s6256_s1 + $0x6d8] sm:$0xff] }
  0x5f   :  { %v4438_v32 = vpack.c.bf16 %v3540_v27, %v3537_v25  ;;  %v2542_v25 = vld [vmem:[%s6259_s4 + $0x108] sm:$0xff] }
  0x60   :  { %v2518_v27 = vld [vmem:[%s6259_s4 + $0x48] sm:$0xff] }
  0x61   :  { %4336 = vmatpush3.bf16.msra.mxu1 %v4335_v37  ;;  %4324 = vmatpush1.bf16.msra.mxu0 %v4323_v38  ;;  %v3500_v37 = vld [vmem:[%s6256_s1 + $0x5d8] sm:$0xff]  ;;  %v3503_v38 = vld [vmem:[%s6256_s1 + $0x5f0] sm:$0xff] }
  0x62   :  { %4353 = vmatprep.subr.bf16.mxu1 %v4639_v0  ;;  %4338 = vmatprep.subr.bf16.mxu0 %v4337_v40  ;;  %v4375_v40 = vpack.c.bf16 %v3496_v36, %v3493_v35  ;;  %v4377_v42 = vpack.c.bf16 %v3503_v38, %v3500_v37  ;;  %v3546_v36 = vld [vmem:[%s6256_s1 + $0x718] sm:$0xff]  ;;  %v3541_v37 = vld [vmem:[%s6256_s1 + $0x6f0] sm:$0xff]  ;;  %v3544_v38 = vld [vmem:[%s6256_s1 + $0x708] sm:$0xff] }
  0x63   :  { %v4441_v41 = vpack.c.bf16 %v3546_v36, %v3543_v34  ;;  %v4642_v34 = vmov 1966171168   ;;  %v2535_v36 = vld [vmem:[%s6259_s4 + $0xd0] sm:$0xff] }
  0x64   :  { %3452 = vmatmul.mubr.msk.f32.vlgmr.msra.gmra.mrb[10].mxu0 %vm69_vm1, %v4784_v47  ;;  %4025 = vmatmul.mubr.msk.f32.vlgmr.msra.gmra.mrb[10].mxu1 %vm69_vm1, %v4784_v47 }
  0x65   :  { %4355 = vmatpush3.bf16.msra.mxu1 %v4354_v46  ;;  %4340 = vmatpush1.bf16.msra.mxu0 %v4339_v48  ;;  %v3509_v46 = vld [vmem:[%s6256_s1 + $0x608] sm:$0xff]  ;;  %v3512_v48 = vld [vmem:[%s6256_s1 + $0x620] sm:$0xff] }
  0x66   :  { %4356 = vmatprep.subr.bf16.mxu1 %v4639_v0  ;;  %4342 = vmatprep.subr.bf16.mxu0 %v4341_v50  ;;  %v4379_v50 = vpack.c.bf16 %v3502_v45, %v3499_v44  ;;  %v4393_v52 = vpack.c.bf16 %v3512_v48, %v3509_v46  ;;  %v3552_v45 = vld [vmem:[%s6256_s1 + $0x748] sm:$0xff]  ;;  %v3547_v46 = vld [vmem:[%s6256_s1 + $0x720] sm:$0xff]  ;;  %v3550_v48 = vld [vmem:[%s6256_s1 + $0x738] sm:$0xff] }
  0x67   :  { %1611 = vmatprep.mubr.f32.mxu0 %v4640_v4  ;;  %4043 = vmatprep.mubr.msk.f32.mxu1 %vm4641_vm0, %v4640_v4  ;;  %v4444_v51 = vpack.c.bf16 %v3552_v45, %v3549_v43 }
  0x69   :  { %4358 = vmatpush3.bf16.msra.mxu1 %v4357_v56  ;;  %4344 = vmatpush1.bf16.msra.mxu0 %v4343_v57  ;;  %v3515_v56 = vld [vmem:[%s6256_s1 + $0x638] sm:$0xff]  ;;  %v3518_v57 = vld [vmem:[%s6256_s1 + $0x650] sm:$0xff] }
  0x6a   :  { %4359 = vmatprep.subr.bf16.mxu1 %v4639_v0  ;;  %4346 = vmatprep.subr.bf16.mxu0 %v4345_v59  ;;  %v4395_v59 = vpack.c.bf16 %v3511_v55, %v3508_v54  ;;  %v4397_v61 = vpack.c.bf16 %v3518_v57, %v3515_v56  ;;  %v3558_v55 = vld [vmem:[%s6256_s1 + $0x778] sm:$0xff]  ;;  %v3556_v56 = vld [vmem:[%s6256_s1 + $0x768] sm:$0xff] }
  0x6b   :  { %v4447_v57 = vpack.c.bf16 %v3558_v55, %v3555_v53  ;;  %v2545_v53 = vld [vmem:[%s6259_s4 + $0x120] sm:$0xff] }
  0x6c   :  { %v2521_v55 = vld [vmem:[%s6259_s4 + $0x60] sm:$0xff] }
  0x6d   :  { %4361 = vmatpush3.bf16.msra.mxu1 %v4360_v2  ;;  %4348 = vmatpush1.bf16.msra.mxu0 %v4347_v3  ;;  %v3521_v2 = vld [vmem:[%s6256_s1 + $0x668] sm:$0xff]  ;;  %v3524_v3 = vld [vmem:[%s6256_s1 + $0x680] sm:$0xff] }
  0x6e   :  { %4362 = vmatprep.subr.bf16.mxu1 %v4639_v0  ;;  %4350 = vmatprep.subr.bf16.mxu0 %v4349_v6  ;;  %v4399_v6 = vpack.c.bf16 %v3517_v1, %v3514_v63  ;;  %v4401_v8 = vpack.c.bf16 %v3524_v3, %v3521_v2  ;;  %v2528_v1 = vld [vmem:[%s6259_s4 + $0x98] sm:$0xff]  ;;  %v2511_v3 = vld [vmem:[%s6259_s4 + $0x10] sm:$0xff] }
  0x71   :  { %4364 = vmatpush3.bf16.msra.mxu1 %v4363_v12  ;;  %4352 = vmatpush1.bf16.msra.mxu0 %v4351_v13  ;;  %v3527_v12 = vld [vmem:[%s6256_s1 + $0x698] sm:$0xff]  ;;  %v3530_v13 = vld [vmem:[%s6256_s1 + $0x6b0] sm:$0xff] }
  0x72   :  { %4381 = vmatprep.subr.bf16.mxu1 %v4639_v0  ;;  %4366 = vmatprep.subr.bf16.mxu0 %v4365_v15  ;;  %v4403_v15 = vpack.c.bf16 %v3523_v11, %v3520_v10  ;;  %v4405_v17 = vpack.c.bf16 %v3530_v13, %v3527_v12  ;;  %v2513_v10 = vld [vmem:[%s6259_s4 + $0x20] sm:$0xff]  ;;  %v2514_v11 = vld [vmem:[%s6259_s4 + $0x28] sm:$0xff]  ;;  %v54_v13 = vlaneseq }
  0x73   :  { %v4459_v12 = vpack.c.bf16 %v2514_v11, %v2513_v10  ;;  %v2524_v10 = vld [vmem:[%s6259_s4 + $0x78] sm:$0xff] }
  0x74   :  { %3479 = vmatmul.mubr.msk.f32.vlgmr.msra.gmra.mrb[12].mxu0 %vm69_vm1, %v4784_v47  ;;  %4044 = vmatmul.mubr.msk.f32.vlgmr.msra.gmra.mrb[12].mxu1 %vm69_vm1, %v4784_v47  ;;  %vm5674_vm5 = vcmp.lt.s32.totalorder %v54_v13, 320 }
  0x75   :  { %4383 = vmatpush3.bf16.msra.mxu1 %v4382_v21  ;;  %4368 = vmatpush1.bf16.msra.mxu0 %v4367_v22  ;;  %v3536_v21 = vld [vmem:[%s6256_s1 + $0x6c8] sm:$0xff]  ;;  %v3539_v22 = vld [vmem:[%s6256_s1 + $0x6e0] sm:$0xff] }
  0x76   :  { %4384 = vmatprep.subr.bf16.mxu1 %v4639_v0  ;;  %4370 = vmatprep.subr.bf16.mxu0 %v4369_v24  ;;  %v4407_v24 = vpack.c.bf16 %v3529_v20, %v3526_v19  ;;  %v4421_v26 = vpack.c.bf16 %v3539_v22, %v3536_v21  ;;  %v55_v20 = vshrl.u32 %v54_v13, 7  ;;  %v2533_v21 = vld [vmem:[%s6259_s4 + $0xc0] sm:$0xff]  ;;  %v2534_v22 = vld [vmem:[%s6259_s4 + $0xc8] sm:$0xff] }
  0x77   :  { %1856 = vmatprep.mubr.f32.mxu0 %v4640_v4  ;;  %4062 = vmatprep.mubr.msk.f32.mxu1 %vm4641_vm0, %v4640_v4 }
  0x79   :  { %4386 = vmatpush3.bf16.msra.mxu1 %v4385_v30  ;;  %4372 = vmatpush1.bf16.msra.mxu0 %v4371_v31  ;;  %v3542_v30 = vld [vmem:[%s6256_s1 + $0x6f8] sm:$0xff]  ;;  %v3545_v31 = vld [vmem:[%s6256_s1 + $0x710] sm:$0xff] }
  0x7a   :  { %4387 = vmatprep.subr.bf16.mxu1 %v4639_v0  ;;  %4374 = vmatprep.subr.bf16.mxu0 %v4373_v33  ;;  %v4423_v33 = vpack.c.bf16 %v3538_v29, %v3535_v28  ;;  %v4425_v35 = vpack.c.bf16 %v3545_v31, %v3542_v30  ;;  %v52_v30 = vld [vmem:[%s6260_s2] sm:$0x7]  ;;  %v5586_v31 = vsub.s32 0, %v55_v20 }
  0x7c   :  { %v57_v45 = vrot.slane %v52_v30, %v5586_v31 }
  0x7d   :  { %4389 = vmatpush3.bf16.msra.mxu1 %v4388_v39  ;;  %4376 = vmatpush1.bf16.msra.mxu0 %v4375_v40  ;;  %v3548_v39 = vld [vmem:[%s6256_s1 + $0x728] sm:$0xff]  ;;  %v3551_v40 = vld [vmem:[%s6256_s1 + $0x740] sm:$0xff] }
  0x7e   :  { %4390 = vmatprep.subr.bf16.mxu1 %v4639_v0  ;;  %4378 = vmatprep.subr.bf16.mxu0 %v4377_v42  ;;  %v4427_v42 = vpack.c.bf16 %v3544_v38, %v3541_v37  ;;  %v4429_v44 = vpack.c.bf16 %v3551_v40, %v3548_v39  ;;  %v2536_v37 = vld [vmem:[%s6259_s4 + $0xd8] sm:$0xff]  ;;  %v2543_v38 = vld [vmem:[%s6259_s4 + $0x110] sm:$0xff] }
  0x7f   :  { %v4469_v39 = vpack.c.bf16 %v2536_v37, %v2535_v36  ;;  %v2544_v40 = vld [vmem:[%s6259_s4 + $0x118] sm:$0xff] }
  0x80   :  { %v4485_v43 = vpack.c.bf16 %v2544_v40, %v2543_v38 }
  0x81   :  { %4392 = vmatpush3.bf16.msra.mxu1 %v4391_v49  ;;  %4380 = vmatpush1.bf16.msra.mxu0 %v4379_v50  ;;  %v3554_v49 = vld [vmem:[%s6256_s1 + $0x758] sm:$0xff]  ;;  %v3557_v50 = vld [vmem:[%s6256_s1 + $0x770] sm:$0xff] }
  0x82   :  { %4409 = vmatprep.subr.bf16.mxu1 %v4639_v0  ;;  %4394 = vmatprep.subr.bf16.mxu0 %v4393_v52  ;;  %v4431_v52 = vpack.c.bf16 %v3550_v48, %v3547_v46  ;;  %v4433_v54 = vpack.c.bf16 %v3557_v50, %v3554_v49  ;;  %v2537_v50 = vld [vmem:[%s6259_s4 + $0xe0] sm:$0xff] }
  0x84   :  { %3506 = vmatmul.mubr.msk.f32.vlgmr.msra.gmra.mrb[14].mxu0 %vm69_vm1, %v4784_v47  ;;  %4063 = vmatmul.mubr.msk.f32.vlgmr.msra.gmra.mrb[14].mxu1 %vm69_vm1, %v4784_v47 }
  0x85   :  { %4411 = vmatpush3.bf16.msra.mxu1 %v4410_v58  ;;  %4396 = vmatpush1.bf16.msra.mxu0 %v4395_v59  ;;  %v2525_v59 = vld [vmem:[%s6259_s4 + $0x80] sm:$0xff] }
  0x86   :  { %4412 = vmatprep.subr.bf16.mxu1 %v4639_v0  ;;  %4398 = vmatprep.subr.bf16.mxu0 %v4397_v61  ;;  %v4449_v61 = vpack.c.bf16 %v2526_v60, %v2525_v59  ;;  %v2522_v59 = vld [vmem:[%s6259_s4 + $0x68] sm:$0xff] }
  0x87   :  { %4081 = vmatprep.mubr.msk.f32.mxu1 %vm4641_vm0, %v4640_v4  ;;  %2101 = vmatprep.mubr.f32.mxu0 %v4640_v4 }
  0x89   :  { %4414 = vmatpush3.bf16.msra.mxu1 %v4413_v5  ;;  %4400 = vmatpush1.bf16.msra.mxu0 %v4399_v6  ;;  %v2512_v5 = vld [vmem:[%s6259_s4 + $0x18] sm:$0xff] }
  0x8a   :  { %4415 = vmatprep.subr.bf16.mxu1 %v4639_v0  ;;  %4402 = vmatprep.subr.bf16.mxu0 %v4401_v8  ;;  %v4455_v6 = vpack.c.bf16 %v2512_v5, %v2511_v3  ;;  %v2530_v8 = vld [vmem:[%s6259_s4 + $0xa8] sm:$0xff]  ;;  %v2540_v3 = vld [vmem:[%s6259_s4 + $0xf8] sm:$0xff]  ;;  %v2547_v5 = vld [vmem:[%s6259_s4 + $0x130] sm:$0xff] }
  0x8b   :  { %v4457_v9 = vpack.c.bf16 %v2530_v8, %v2529_v7  ;;  %v2548_v8 = vld [vmem:[%s6259_s4 + $0x138] sm:$0xff] }
  0x8d   :  { %4417 = vmatpush3.bf16.msra.mxu1 %v4416_v14  ;;  %4404 = vmatpush1.bf16.msra.mxu0 %v4403_v15  ;;  %v2531_v14 = vld [vmem:[%s6259_s4 + $0xb0] sm:$0xff]  ;;  %v2532_v15 = vld [vmem:[%s6259_s4 + $0xb8] sm:$0xff] }
  0x8e   :  { %4418 = vmatprep.subr.bf16.mxu1 %v4639_v0  ;;  %4406 = vmatprep.subr.bf16.mxu0 %v4405_v17  ;;  %v4461_v16 = vpack.c.bf16 %v2532_v15, %v2531_v14  ;;  %v2515_v17 = vld [vmem:[%s6259_s4 + $0x30] sm:$0xff]  ;;  %v4493_v14 = vpack.c.bf16 %v2548_v8, %v2547_v5 }
  0x8f   :  { %v4463_v19 = vpack.c.bf16 %v2516_v18, %v2515_v17 }
  0x91   :  { %4420 = vmatpush3.bf16.msra.mxu1 %v4419_v23  ;;  %4408 = vmatpush1.bf16.msra.mxu0 %v4407_v24  ;;  %v2541_v23 = vld [vmem:[%s6259_s4 + $0x100] sm:$0xff]  ;;  %v4465_v24 = vpack.c.bf16 %v2534_v22, %v2533_v21 }
  0x92   :  { %4437 = vmatprep.subr.bf16.mxu1 %v4639_v0  ;;  %4422 = vmatprep.subr.bf16.mxu0 %v4421_v26  ;;  %v2517_v26 = vld [vmem:[%s6259_s4 + $0x40] sm:$0xff]  ;;  %v4481_v28 = vpack.c.bf16 %v2542_v25, %v2541_v23  ;;  %v3584_v23 = vld [vmem:[%s6259_s4 + $0x1c8] sm:$0xff] }
  0x93   :  { %v4467_v29 = vpack.c.bf16 %v2518_v27, %v2517_v26  ;;  %v3583_v22 = vld [vmem:[%s6259_s4 + $0x1c0] sm:$0xff] }
  0x94   :  { %4082 = vmatmul.mubr.msk.f32.vlgmr.msra.gmra.mrb[16].mxu1 %vm69_vm1, %v4784_v47  ;;  %3533 = vmatmul.mubr.msk.f32.vlgmr.msra.gmra.mrb[16].mxu0 %vm69_vm1, %v4784_v47  ;;  %v4497_v25 = vpack.c.bf16 %v3584_v23, %v3583_v22  ;;  %v3627_v26 = vld [vmem:[%s6259_s4 + $0x300] sm:$0xff]  ;;  %v3397_v22 = vld [vmem:[%s6260_s2 + $0x9] sm:$0x7] }
  0x95   :  { %4439 = vmatpush3.bf16.msra.mxu1 %v4438_v32  ;;  %4424 = vmatpush1.bf16.msra.mxu0 %v4423_v33  ;;  %v5588_v32 = vsub.s32 2, %v55_v20  ;;  %v5590_v33 = vsub.s32 1, %v55_v20 }
  0x96   :  { %4440 = vmatprep.subr.bf16.mxu1 %v4639_v0  ;;  %4426 = vmatprep.subr.bf16.mxu0 %v4425_v35  ;;  %v229_v35 = vunpack.c.l.s4 %v4642_v34 }
  0x97   :  { %4100 = vmatprep.mubr.msk.f32.mxu1 %vm4641_vm0, %v4640_v4  ;;  %2346 = vmatprep.mubr.f32.mxu0 %v4640_v4  ;;  %v3553_v4 = vld [vmem:[%s6256_s1 + $0x750] sm:$0xff]  ;;  %v65_v46 = vrot.slane %v52_v30, %v5588_v32  ;;  %v61_v48 = vrot.slane %v52_v30, %v5590_v33  ;;  %v3602_v30 = vld [vmem:[%s6259_s4 + $0x258] sm:$0xff] }
  0x98   :  { %v4435_v58 = vpack.c.bf16 %v3556_v56, %v3553_v4  ;;  %v230_v49 = vunpack.c.0.s8 %v229_v35  ;;  %v5628_v56 = vstv %s4626_s21 }
  0x99   :  { %4442 = vmatpush3.bf16.msra.mxu1 %v4441_v41  ;;  %4428 = vmatpush1.bf16.msra.mxu0 %v4427_v42  ;;  %v2519_v41 = vld [vmem:[%s6259_s4 + $0x50] sm:$0xff]  ;;  %v2520_v42 = vld [vmem:[%s6259_s4 + $0x58] sm:$0xff] }
  0x9a   :  { %4443 = vmatprep.subr.bf16.mxu1 %v4639_v0  ;;  %4430 = vmatprep.subr.bf16.mxu0 %v4429_v44  ;;  %v4471_v44 = vpack.c.bf16 %v2520_v42, %v2519_v41 }
  0x9d   :  { %4445 = vmatpush3.bf16.msra.mxu1 %v4444_v51  ;;  %4432 = vmatpush1.bf16.msra.mxu0 %v4431_v52  ;;  %v2538_v51 = vld [vmem:[%s6259_s4 + $0xe8] sm:$0xff] }
  0x9e   :  { %4446 = vmatprep.subr.bf16.mxu1 %v4639_v0  ;;  %4434 = vmatprep.subr.bf16.mxu0 %v4433_v54  ;;  %v2509_v0 = vld [vmem:[%s6259_s4] sm:$0xff]  ;;  %v4473_v52 = vpack.c.bf16 %v2538_v51, %v2537_v50  ;;  %v2546_v54 = vld [vmem:[%s6259_s4 + $0x128] sm:$0xff] }
  0x9f   :  { %v4451_v63 = vpack.c.bf16 %v2510_v62, %v2509_v0 }
  0xa1   :  { %4448 = vmatpush3.bf16.msra.mxu1 %v4447_v57  ;;  %4436 = vmatpush1.bf16.msra.mxu0 %v4435_v58  ;;  %v4489_v58 = vpack.c.bf16 %v2546_v54, %v2545_v53 }
  0xa2   :  { %4450 = vmatprep.subr.bf16.mxu0 %v4449_v61  ;;  %4482 = vmatprep.subr.bf16.mxu1 %v4481_v28 }
  0xa4   :  { %4101 = vmatmul.mubr.msk.f32.vlgmr.msra.gmra.mrb[18].mxu1 %vm69_vm1, %v4784_v47  ;;  %3560 = vmatmul.mubr.msk.f32.vlgmr.msra.gmra.mrb[18].mxu0 %vm69_vm1, %v4784_v47  ;;  %v2527_v47 = vld [vmem:[%s6259_s4 + $0x90] sm:$0xff] }
  0xa5   :  { %4452 = vmatpush3.bf16.msra.mxu0 %v4451_v63  ;;  %v4453_v2 = vpack.c.bf16 %v2528_v1, %v2527_v47  ;;  %4484 = vmatpush3.bf16.msra.mxu1 %v4481_v28  ;;  %v4475_v63 = vpack.c.bf16 %v2522_v59, %v2521_v55  ;;  %v5633_v1 = vsub.s32 %v230_v49, %v55_v20 }
  0xa6   :  { %4486 = vmatprep.subr.bf16.mxu1 %v4485_v43 }
  0xa7   :  { %4454 = vmatprep.subr.bf16.mxu0 %v4453_v2  ;;  %v2539_v2 = vld [vmem:[%s6259_s4 + $0xf0] sm:$0xff] }
  0xa9   :  { %4456 = vmatpush3.bf16.msra.mxu0 %v4455_v6  ;;  %4488 = vmatpush3.bf16.msra.mxu1 %v4485_v43 }
  0xaa   :  { %4458 = vmatprep.subr.bf16.mxu0 %v4457_v9  ;;  %4490 = vmatprep.subr.bf16.mxu1 %v4489_v58  ;;  %v2523_v9 = vld [vmem:[%s6259_s4 + $0x70] sm:$0xff] }
  0xab   :  { %v4479_v17 = vpack.c.bf16 %v2524_v10, %v2523_v9 }
  0xad   :  { %4460 = vmatpush3.bf16.msra.mxu0 %v4459_v12  ;;  %4492 = vmatpush3.bf16.msra.mxu1 %v4489_v58  ;;  %v4477_v12 = vpack.c.bf16 %v2540_v3, %v2539_v2  ;;  %v3370_v58 = vld [vmem:[%s6260_s2 + $0x6] sm:$0x7] }
  0xae   :  { %4462 = vmatprep.subr.bf16.mxu0 %v4461_v16  ;;  %4494 = vmatprep.subr.bf16.mxu1 %v4493_v14 }
  0xb1   :  { %4464 = vmatpush3.bf16.msra.mxu0 %v4463_v19  ;;  %4496 = vmatpush3.bf16.msra.mxu1 %v4493_v14 }
  0xb2   :  { %4466 = vmatprep.subr.bf16.mxu0 %v4465_v24  ;;  %v3343_v24 = vld [vmem:[%s6260_s2 + $0x3] sm:$0x7]  ;;  %4498 = vmatprep.subr.bf16.mxu1 %v4497_v25 }
  0xb3   :  { %v310_v37 = vrot.slane %v3343_v24, %v5586_v31  ;;  %v318_v38 = vrot.slane %v3343_v24, %v5588_v32 }
  0xb5   :  { %4468 = vmatpush3.bf16.msra.mxu0 %v4467_v29  ;;  %v3628_v29 = vld [vmem:[%s6259_s4 + $0x308] sm:$0xff] }
  0xb6   :  { %4470 = vmatprep.subr.bf16.mxu0 %v4469_v39  ;;  %v4545_v34 = vpack.c.bf16 %v3628_v29, %v3627_v26  ;;  %v314_v39 = vrot.slane %v3343_v24, %v5590_v33  ;;  %v804_v29 = vrot.slane %v3397_v22, %v5590_v33 }
  0xb9   :  { %4472 = vmatpush3.bf16.msra.mxu0 %v4471_v44 }
  0xba   :  { %4474 = vmatprep.subr.bf16.mxu0 %v4473_v52 }
  0xbd   :  { %4476 = vmatpush3.bf16.msra.mxu0 %v4475_v63  ;;  %v563_v63 = vrot.slane %v3370_v58, %v5588_v32 }
  0xbe   :  { %4478 = vmatprep.subr.bf16.mxu0 %v4477_v12 }
  0xc1   :  { %4480 = vmatpush3.bf16.msra.mxu0 %v4479_v17 }
  0xc2   :  { %4546 = vmatprep.subr.bf16.mxu0 %v4545_v34 }
  0xe7   :  { %v139_v4 = vpop.f32.mrb[0].mxu0  ;;  %v210_v57 = vpop.f32.mrb[0].mxu1 }
  0xe8   :  { %v140_v60 = vadd.f32 %v139_v4, %v57_v45  ;;  %v141_v61 = vpop.f32.mrb[1].mxu0  ;;  %v211_v0 = vadd.f32 %v210_v57, %v65_v46  ;;  %v3931_v62 = vpop.f32.mrb[1].mxu1 }
  0xe9   :  { %v142_v47 = vadd.f32 %v141_v61, %v61_v48  ;;  %v555_v62 = vrot.slane %v3370_v58, %v5586_v31 }
  0xea   :  { %vm214_vm2 = vcmp.gt.f32.partialorder %v140_v60, 0.0  ;;  %v218_v6 = vmul.f32 %v5628_v56, %v140_v60  ;;  %vm216_vm3 = vcmp.gt.f32.partialorder %v211_v0, 0.0  ;;  %v220_v7 = vmul.f32 %v5628_v56, %v211_v0 }
  0xeb   :  { %vm215_vm4 = vcmp.gt.f32.partialorder %v142_v47, 0.0  ;;  %v219_v11 = vmul.f32 %v5628_v56, %v142_v47 }
  0xec   :  { %v221_v15 = vsel %vm214_vm2, %v140_v60, %v218_v6  ;;  %v223_v16 = vsel %vm216_vm3, %v211_v0, %v220_v7 }
  0xed   :  { %v222_v18 = vsel %vm215_vm4, %v142_v47, %v219_v11  ;;  %v241_v20 = vrot.slane %v223_v16, %v5633_v1  ;;  %v559_v47 = vrot.slane %v3370_v58, %v5590_v33 }
  0xee   :  { %v227_v19 = vcombine.low %v221_v15, %v222_v18 }
  0xf0   :  { %v234_v21 = vrot.slane %v227_v19, %v5633_v1 }
  0xf2   :  { %v242_v27 = vcombine.low %v234_v21, %v241_v20  ;;  %v243_v28 = vcombine.high %v234_v21, %v241_v20 }
  0xf4   :  { %v250_v35 = vrot.slane %v242_v27, %v5633_v1  ;;  %v257_v36 = vrot.slane %v243_v28, %v5633_v1  ;;  %v800_v27 = vrot.slane %v3397_v22, %v5586_v31  ;;  %v808_v28 = vrot.slane %v3397_v22, %v5588_v32 }
  0xf6   :  { %v258_v40 = vcombine.high %v250_v35, %v250_v35  ;;  %v259_v41 = vcombine.high %v257_v36, %v257_v36  ;;  %268 = vst.msk [vmem:[#allocation2] ss:$8 sm:$0x7] %vm5674_vm5, %v250_v35  ;;  %271 = vst.msk [vmem:[#allocation2 + $0x30] ss:$8 sm:$0x7] %vm5674_vm5, %v257_v36 }
  0xf7   :  { %v388_v13 = vpop.f32.mrb[2].mxu0  ;;  %v459_v42 = vpop.f32.mrb[2].mxu1 }
  0xf8   :  { %274 = vst.msk [vmem:[#allocation2 + $0x60] ss:$8 sm:$0x7] %vm5674_vm5, %v258_v40  ;;  %277 = vst.msk [vmem:[#allocation2 + $0x90] ss:$8 sm:$0x7] %vm5674_vm5, %v259_v41  ;;  %v389_v43 = vadd.f32 %v388_v13, %v310_v37  ;;  %v460_v45 = vadd.f32 %v459_v42, %v318_v38 }
  0xf9   :  { %v390_v44 = vpop.f32.mrb[3].mxu0  ;;  %v3950_v46 = vpop.f32.mrb[3].mxu1 }
  0xfa   :  { %v391_v48 = vadd.f32 %v390_v44, %v314_v39  ;;  %vm463_vm6 = vcmp.gt.f32.partialorder %v389_v43, 0.0  ;;  %v466_v49 = vmul.f32 %v389_v43, %v5628_v56  ;;  %vm465_vm7 = vcmp.gt.f32.partialorder %v460_v45, 0.0 }
  0xfb   :  { %v468_v50 = vmul.f32 %v460_v45, %v5628_v56 }
  0xfc   :  { %vm464_vm8 = vcmp.gt.f32.partialorder %v391_v48, 0.0  ;;  %v467_v51 = vmul.f32 %v391_v48, %v5628_v56  ;;  %v469_v52 = vsel %vm463_vm6, %v389_v43, %v466_v49 }
  0xfd   :  { %v471_v53 = vsel %vm465_vm7, %v460_v45, %v468_v50 }
  0xfe   :  { %v470_v54 = vsel %vm464_vm8, %v391_v48, %v467_v51  ;;  %v489_v4 = vrot.slane %v471_v53, %v5633_v1 }
  0xff   :  { %v475_v55 = vcombine.low %v469_v52, %v470_v54  ;;  %v3424_v52 = vld [vmem:[%s6260_s2 + $0xc] sm:$0x7] }
 0x100   :  { %v1053_v58 = vrot.slane %v3424_v52, %v5588_v32 }
 0x101   :  { %v482_v57 = vrot.slane %v475_v55, %v5633_v1 }
 0x103   :  { %v490_v59 = vcombine.low %v482_v57, %v489_v4  ;;  %v491_v60 = vcombine.high %v482_v57, %v489_v4  ;;  %v1045_v57 = vrot.slane %v3424_v52, %v5586_v31 }
 0x105   :  { %v498_v61 = vrot.slane %v490_v59, %v5633_v1  ;;  %v505_v0 = vrot.slane %v491_v60, %v5633_v1  ;;  %v1049_v59 = vrot.slane %v3424_v52, %v5590_v33 }
 0x107   :  { %v506_v2 = vcombine.high %v498_v61, %v498_v61  ;;  %v507_v3 = vcombine.high %v505_v0, %v505_v0  ;;  %513 = vst.msk [vmem:[#allocation2 + $0x1] ss:$8 sm:$0x7] %vm5674_vm5, %v498_v61  ;;  %516 = vst.msk [vmem:[#allocation2 + $0x31] ss:$8 sm:$0x7] %vm5674_vm5, %v505_v0 }
 0x108   :  { %v633_v5 = vpop.f32.mrb[4].mxu0  ;;  %v704_v6 = vpop.f32.mrb[4].mxu1 }
 0x109   :  { %519 = vst.msk [vmem:[#allocation2 + $0x61] ss:$8 sm:$0x7] %vm5674_vm5, %v506_v2  ;;  %522 = vst.msk [vmem:[#allocation2 + $0x91] ss:$8 sm:$0x7] %vm5674_vm5, %v507_v3  ;;  %v634_v7 = vadd.f32 %v633_v5, %v555_v62  ;;  %v705_v9 = vadd.f32 %v704_v6, %v563_v63 }
 0x10a   :  { %v635_v8 = vpop.f32.mrb[5].mxu0  ;;  %v3969_v10 = vpop.f32.mrb[5].mxu1 }
 0x10b   :  { %v636_v11 = vadd.f32 %v635_v8, %v559_v47  ;;  %vm708_vm9 = vcmp.gt.f32.partialorder %v634_v7, 0.0  ;;  %v711_v12 = vmul.f32 %v634_v7, %v5628_v56  ;;  %vm710_vm10 = vcmp.gt.f32.partialorder %v705_v9, 0.0 }
 0x10c   :  { %v713_v14 = vmul.f32 %v705_v9, %v5628_v56 }
 0x10d   :  { %vm709_vm11 = vcmp.gt.f32.partialorder %v636_v11, 0.0  ;;  %v712_v15 = vmul.f32 %v636_v11, %v5628_v56  ;;  %v714_v16 = vsel %vm708_vm9, %v634_v7, %v711_v12 }
 0x10e   :  { %v716_v17 = vsel %vm710_vm10, %v705_v9, %v713_v14 }
 0x10f   :  { %v715_v18 = vsel %vm709_vm11, %v636_v11, %v712_v15  ;;  %v734_v20 = vrot.slane %v716_v17, %v5633_v1 }
 0x110   :  { %v720_v19 = vcombine.low %v714_v16, %v715_v18  ;;  %v3451_v16 = vld [vmem:[%s6260_s2 + $0xf] sm:$0x7] }
 0x111   :  { %v1298_v22 = vrot.slane %v3451_v16, %v5588_v32 }
 0x112   :  { %v727_v21 = vrot.slane %v720_v19, %v5633_v1 }
 0x114   :  { %v735_v23 = vcombine.low %v727_v21, %v734_v20  ;;  %v736_v24 = vcombine.high %v727_v21, %v734_v20  ;;  %v1290_v21 = vrot.slane %v3451_v16, %v5586_v31 }
 0x116   :  { %v743_v25 = vrot.slane %v735_v23, %v5633_v1  ;;  %v750_v26 = vrot.slane %v736_v24, %v5633_v1  ;;  %v1294_v23 = vrot.slane %v3451_v16, %v5590_v33 }
 0x117   :  { %v878_v36 = vpop.f32.mrb[6].mxu0  ;;  %v949_v37 = vpop.f32.mrb[6].mxu1 }
 0x118   :  { %v751_v34 = vcombine.high %v743_v25, %v743_v25  ;;  %v752_v35 = vcombine.high %v750_v26, %v750_v26  ;;  %758 = vst.msk [vmem:[#allocation2 + $0x2] ss:$8 sm:$0x7] %vm5674_vm5, %v743_v25  ;;  %761 = vst.msk [vmem:[#allocation2 + $0x32] ss:$8 sm:$0x7] %vm5674_vm5, %v750_v26  ;;  %v879_v38 = vadd.f32 %v878_v36, %v800_v27 }
 0x119   :  { %v880_v39 = vpop.f32.mrb[7].mxu0  ;;  %v950_v40 = vadd.f32 %v949_v37, %v808_v28  ;;  %v3988_v41 = vpop.f32.mrb[7].mxu1 }
 0x11a   :  { %764 = vst.msk [vmem:[#allocation2 + $0x62] ss:$8 sm:$0x7] %vm5674_vm5, %v751_v34  ;;  %767 = vst.msk [vmem:[#allocation2 + $0x92] ss:$8 sm:$0x7] %vm5674_vm5, %v752_v35  ;;  %v881_v13 = vadd.f32 %v880_v39, %v804_v29  ;;  %v956_v42 = vmul.f32 %v879_v38, %v5628_v56 }
 0x11b   :  { %vm953_vm12 = vcmp.gt.f32.partialorder %v879_v38, 0.0  ;;  %vm955_vm13 = vcmp.gt.f32.partialorder %v950_v40, 0.0  ;;  %v958_v43 = vmul.f32 %v950_v40, %v5628_v56 }
 0x11c   :  { %vm954_vm14 = vcmp.gt.f32.partialorder %v881_v13, 0.0  ;;  %v957_v44 = vmul.f32 %v881_v13, %v5628_v56  ;;  %v959_v45 = vsel %vm953_vm12, %v879_v38, %v956_v42 }
 0x11d   :  { %v961_v46 = vsel %vm955_vm13, %v950_v40, %v958_v43 }
 0x11e   :  { %v960_v48 = vsel %vm954_vm14, %v881_v13, %v957_v44  ;;  %v979_v50 = vrot.slane %v961_v46, %v5633_v1 }
 0x11f   :  { %v965_v49 = vcombine.low %v959_v45, %v960_v48  ;;  %v3478_v45 = vld [vmem:[%s6260_s2 + $0x12] sm:$0x7] }
 0x120   :  { %v1543_v52 = vrot.slane %v3478_v45, %v5588_v32 }
 0x121   :  { %v972_v51 = vrot.slane %v965_v49, %v5633_v1 }
 0x123   :  { %v980_v53 = vcombine.low %v972_v51, %v979_v50  ;;  %v981_v54 = vcombine.high %v972_v51, %v979_v50  ;;  %v1535_v51 = vrot.slane %v3478_v45, %v5586_v31 }
 0x125   :  { %v988_v55 = vrot.slane %v980_v53, %v5633_v1  ;;  %v995_v4 = vrot.slane %v981_v54, %v5633_v1  ;;  %v1539_v53 = vrot.slane %v3478_v45, %v5590_v33 }
 0x127   :  { %v996_v60 = vcombine.high %v988_v55, %v988_v55  ;;  %v997_v61 = vcombine.high %v995_v4, %v995_v4  ;;  %1003 = vst.msk [vmem:[#allocation2 + $0x3] ss:$8 sm:$0x7] %vm5674_vm5, %v988_v55  ;;  %1006 = vst.msk [vmem:[#allocation2 + $0x33] ss:$8 sm:$0x7] %vm5674_vm5, %v995_v4 }
 0x128   :  { %v1123_v0 = vpop.f32.mrb[8].mxu0  ;;  %v1194_v62 = vpop.f32.mrb[8].mxu1 }
 0x129   :  { %1009 = vst.msk [vmem:[#allocation2 + $0x63] ss:$8 sm:$0x7] %vm5674_vm5, %v996_v60  ;;  %1012 = vst.msk [vmem:[#allocation2 + $0x93] ss:$8 sm:$0x7] %vm5674_vm5, %v997_v61  ;;  %v1124_v63 = vadd.f32 %v1123_v0, %v1045_v57  ;;  %v1195_v2 = vadd.f32 %v1194_v62, %v1053_v58 }
 0x12a   :  { %v1125_v47 = vpop.f32.mrb[9].mxu0  ;;  %v4007_v3 = vpop.f32.mrb[9].mxu1 }
 0x12b   :  { %v1126_v5 = vadd.f32 %v1125_v47, %v1049_v59  ;;  %vm1198_vm15 = vcmp.gt.f32.partialorder %v1124_v63, 0.0  ;;  %v1201_v6 = vmul.f32 %v1124_v63, %v5628_v56  ;;  %vm1200_vm0 = vcmp.gt.f32.partialorder %v1195_v2, 0.0 }
 0x12c   :  { %v1203_v7 = vmul.f32 %v1195_v2, %v5628_v56 }
 0x12d   :  { %vm1199_vm2 = vcmp.gt.f32.partialorder %v1126_v5, 0.0  ;;  %v1202_v8 = vmul.f32 %v1126_v5, %v5628_v56  ;;  %v1204_v9 = vsel %vm1198_vm15, %v1124_v63, %v1201_v6 }
 0x12e   :  { %v1206_v10 = vsel %vm1200_vm0, %v1195_v2, %v1203_v7 }
 0x12f   :  { %v1205_v11 = vsel %vm1199_vm2, %v1126_v5, %v1202_v8  ;;  %v1224_v14 = vrot.slane %v1206_v10, %v5633_v1 }
 0x130   :  { %v1210_v12 = vcombine.low %v1204_v9, %v1205_v11  ;;  %v3505_v9 = vld [vmem:[%s6260_s2 + $0x15] sm:$0x7] }
 0x131   :  { %v1788_v16 = vrot.slane %v3505_v9, %v5588_v32 }
 0x132   :  { %v1217_v15 = vrot.slane %v1210_v12, %v5633_v1 }
 0x134   :  { %v1225_v17 = vcombine.low %v1217_v15, %v1224_v14  ;;  %v1226_v18 = vcombine.high %v1217_v15, %v1224_v14  ;;  %v1780_v15 = vrot.slane %v3505_v9, %v5586_v31 }
 0x136   :  { %v1233_v19 = vrot.slane %v1225_v17, %v5633_v1  ;;  %v1240_v20 = vrot.slane %v1226_v18, %v5633_v1  ;;  %v1784_v17 = vrot.slane %v3505_v9, %v5590_v33  ;;  %v3614_v9 = vld [vmem:[%s6259_s4 + $0x298] sm:$0xff] }
 0x137   :  { %v1368_v26 = vpop.f32.mrb[10].mxu0  ;;  %v1439_v27 = vpop.f32.mrb[10].mxu1 }
 0x138   :  { %v1241_v24 = vcombine.high %v1233_v19, %v1233_v19  ;;  %v1242_v25 = vcombine.high %v1240_v20, %v1240_v20  ;;  %1248 = vst.msk [vmem:[#allocation2 + $0x4] ss:$8 sm:$0x7] %vm5674_vm5, %v1233_v19  ;;  %1251 = vst.msk [vmem:[#allocation2 + $0x34] ss:$8 sm:$0x7] %vm5674_vm5, %v1240_v20  ;;  %v1369_v28 = vadd.f32 %v1368_v26, %v1290_v21 }
 0x139   :  { %v1370_v29 = vpop.f32.mrb[11].mxu0  ;;  %v1440_v34 = vadd.f32 %v1439_v27, %v1298_v22  ;;  %v4026_v35 = vpop.f32.mrb[11].mxu1 }
 0x13a   :  { %1254 = vst.msk [vmem:[#allocation2 + $0x64] ss:$8 sm:$0x7] %vm5674_vm5, %v1241_v24  ;;  %1257 = vst.msk [vmem:[#allocation2 + $0x94] ss:$8 sm:$0x7] %vm5674_vm5, %v1242_v25  ;;  %v1371_v36 = vadd.f32 %v1370_v29, %v1294_v23  ;;  %v1446_v37 = vmul.f32 %v1369_v28, %v5628_v56 }
 0x13b   :  { %vm1443_vm3 = vcmp.gt.f32.partialorder %v1369_v28, 0.0  ;;  %vm1445_vm4 = vcmp.gt.f32.partialorder %v1440_v34, 0.0  ;;  %v1448_v38 = vmul.f32 %v1440_v34, %v5628_v56 }
 0x13c   :  { %vm1444_vm6 = vcmp.gt.f32.partialorder %v1371_v36, 0.0  ;;  %v1447_v39 = vmul.f32 %v1371_v36, %v5628_v56  ;;  %v1449_v40 = vsel %vm1443_vm3, %v1369_v28, %v1446_v37 }
 0x13d   :  { %v1451_v41 = vsel %vm1445_vm4, %v1440_v34, %v1448_v38  ;;  %vm2761_vm4 = vcmask 1046528  }
 0x13e   :  { %v1450_v13 = vsel %vm1444_vm6, %v1371_v36, %v1447_v39  ;;  %v1469_v43 = vrot.slane %v1451_v41, %v5633_v1  ;;  %vm3029_vm6 = vcmask 1045504  }
 0x13f   :  { %v1455_v42 = vcombine.low %v1449_v40, %v1450_v13  ;;  %v3532_v40 = vld [vmem:[%s6260_s2 + $0x18] sm:$0x7] }
 0x140   :  { %v2025_v45 = vrot.slane %v3532_v40, %v5586_v31 }
 0x141   :  { %v1462_v44 = vrot.slane %v1455_v42, %v5633_v1 }
 0x143   :  { %v1470_v46 = vcombine.low %v1462_v44, %v1469_v43  ;;  %v1471_v48 = vcombine.high %v1462_v44, %v1469_v43  ;;  %v2033_v44 = vrot.slane %v3532_v40, %v5588_v32 }
 0x145   :  { %v1478_v49 = vrot.slane %v1470_v46, %v5633_v1  ;;  %v1485_v50 = vrot.slane %v1471_v48, %v5633_v1  ;;  %v2029_v46 = vrot.slane %v3532_v40, %v5590_v33  ;;  %v3615_v40 = vld [vmem:[%s6259_s4 + $0x2a0] sm:$0xff] }
 0x147   :  { %v1486_v54 = vcombine.high %v1478_v49, %v1478_v49  ;;  %v1487_v55 = vcombine.high %v1485_v50, %v1485_v50  ;;  %1493 = vst.msk [vmem:[#allocation2 + $0x5] ss:$8 sm:$0x7] %vm5674_vm5, %v1478_v49  ;;  %1496 = vst.msk [vmem:[#allocation2 + $0x35] ss:$8 sm:$0x7] %vm5674_vm5, %v1485_v50 }
 0x148   :  { %v1613_v4 = vpop.f32.mrb[12].mxu0  ;;  %v1684_v57 = vpop.f32.mrb[12].mxu1 }
 0x149   :  { %1499 = vst.msk [vmem:[#allocation2 + $0x65] ss:$8 sm:$0x7] %vm5674_vm5, %v1486_v54  ;;  %1502 = vst.msk [vmem:[#allocation2 + $0x95] ss:$8 sm:$0x7] %vm5674_vm5, %v1487_v55  ;;  %v1614_v58 = vadd.f32 %v1613_v4, %v1535_v51  ;;  %v1685_v60 = vadd.f32 %v1684_v57, %v1543_v52 }
 0x14a   :  { %v1615_v59 = vpop.f32.mrb[13].mxu0  ;;  %v4045_v61 = vpop.f32.mrb[13].mxu1  ;;  %v3567_v57 = vld [vmem:[%s6259_s4 + $0x140] sm:$0xff] }
 0x14b   :  { %v1616_v0 = vadd.f32 %v1615_v59, %v1539_v53  ;;  %vm1688_vm7 = vcmp.gt.f32.partialorder %v1614_v58, 0.0  ;;  %v1691_v62 = vmul.f32 %v1614_v58, %v5628_v56  ;;  %vm1690_vm8 = vcmp.gt.f32.partialorder %v1685_v60, 0.0  ;;  %v3611_v61 = vld [vmem:[%s6259_s4 + $0x280] sm:$0xff] }
 0x14c   :  { %v1693_v63 = vmul.f32 %v1685_v60, %v5628_v56 }
 0x14d   :  { %vm1689_vm9 = vcmp.gt.f32.partialorder %v1616_v0, 0.0  ;;  %v1692_v47 = vmul.f32 %v1616_v0, %v5628_v56  ;;  %v1694_v2 = vsel %vm1688_vm7, %v1614_v58, %v1691_v62  ;;  %v3568_v58 = vld [vmem:[%s6259_s4 + $0x148] sm:$0xff]  ;;  %v3585_v62 = vld [vmem:[%s6259_s4 + $0x1d0] sm:$0xff] }
 0x14e   :  { %v1696_v3 = vsel %vm1690_vm8, %v1685_v60, %v1693_v63 }
 0x14f   :  { %v1695_v5 = vsel %vm1689_vm9, %v1616_v0, %v1692_v47  ;;  %v1714_v7 = vrot.slane %v1696_v3, %v5633_v1  ;;  %v3612_v0 = vld [vmem:[%s6259_s4 + $0x288] sm:$0xff]  ;;  %v3586_v47 = vld [vmem:[%s6259_s4 + $0x1d8] sm:$0xff] }
 0x150   :  { %v1700_v6 = vcombine.low %v1694_v2, %v1695_v5  ;;  %v3629_v2 = vld [vmem:[%s6259_s4 + $0x310] sm:$0xff]  ;;  %v3630_v3 = vld [vmem:[%s6259_s4 + $0x318] sm:$0xff] }
 0x152   :  { %v1707_v8 = vrot.slane %v1700_v6, %v5633_v1  ;;  %v3569_v6 = vld [vmem:[%s6259_s4 + $0x150] sm:$0xff] }
 0x154   :  { %v1715_v10 = vcombine.low %v1707_v8, %v1714_v7  ;;  %v1716_v11 = vcombine.high %v1707_v8, %v1714_v7  ;;  %v3570_v7 = vld [vmem:[%s6259_s4 + $0x158] sm:$0xff]  ;;  %v3613_v8 = vld [vmem:[%s6259_s4 + $0x290] sm:$0xff] }
 0x156   :  { %v1723_v12 = vrot.slane %v1715_v10, %v5633_v1  ;;  %v1730_v14 = vrot.slane %v1716_v11, %v5633_v1  ;;  %v5880_v10 = vld [vmem:[%s6259_s4 + $0x1e0] sm:$0xff] }
 0x157   :  { %v1858_v20 = vpop.f32.mrb[14].mxu0  ;;  %v1929_v21 = vpop.f32.mrb[14].mxu1 }
 0x158   :  { %v1731_v18 = vcombine.high %v1723_v12, %v1723_v12  ;;  %v1732_v19 = vcombine.high %v1730_v14, %v1730_v14  ;;  %1738 = vst.msk [vmem:[#allocation2 + $0x6] ss:$8 sm:$0x7] %vm5674_vm5, %v1723_v12  ;;  %1741 = vst.msk [vmem:[#allocation2 + $0x36] ss:$8 sm:$0x7] %vm5674_vm5, %v1730_v14  ;;  %v1859_v22 = vadd.f32 %v1858_v20, %v1780_v15 }
 0x159   :  { %v1860_v23 = vpop.f32.mrb[15].mxu0  ;;  %v1930_v24 = vadd.f32 %v1929_v21, %v1788_v16  ;;  %v4064_v25 = vpop.f32.mrb[15].mxu1  ;;  %v4501_v21 = vpack.c.bf16 %v3586_v47, %v3585_v62 }
 0x15a   :  { %1744 = vst.msk [vmem:[#allocation2 + $0x66] ss:$8 sm:$0x7] %vm5674_vm5, %v1731_v18  ;;  %1747 = vst.msk [vmem:[#allocation2 + $0x96] ss:$8 sm:$0x7] %vm5674_vm5, %v1732_v19  ;;  %v1861_v26 = vadd.f32 %v1860_v23, %v1784_v17  ;;  %v1936_v27 = vmul.f32 %v1859_v22, %v5628_v56  ;;  %v4499_v17 = vpack.c.bf16 %v3568_v58, %v3567_v57 }
 0x15b   :  { %vm1933_vm10 = vcmp.gt.f32.partialorder %v1859_v22, 0.0  ;;  %vm1935_vm11 = vcmp.gt.f32.partialorder %v1930_v24, 0.0  ;;  %v1938_v28 = vmul.f32 %v1930_v24, %v5628_v56  ;;  %v4547_v18 = vpack.c.bf16 %v3612_v0, %v3611_v61  ;;  %v3588_v23 = vld [vmem:[%s6259_s4 + $0x1e8] sm:$0xff]  ;;  %v3574_v57 = vld [vmem:[%s6259_s4 + $0x178] sm:$0xff]  ;;  %v3617_v58 = vld [vmem:[%s6259_s4 + $0x2b0] sm:$0xff] }
 0x15c   :  { %vm1934_vm12 = vcmp.gt.f32.partialorder %v1861_v26, 0.0  ;;  %v1937_v29 = vmul.f32 %v1861_v26, %v5628_v56  ;;  %v1939_v34 = vsel %vm1933_vm10, %v1859_v22, %v1936_v27  ;;  %v4549_v22 = vpack.c.bf16 %v3630_v3, %v3629_v2  ;;  %v3632_v27 = vld [vmem:[%s6259_s4 + $0x328] sm:$0xff]  ;;  %v3591_v61 = vld [vmem:[%s6259_s4 + $0x200] sm:$0xff] }
 0x15d   :  { %v1941_v35 = vsel %vm1935_vm11, %v1930_v24, %v1938_v28  ;;  %v3631_v24 = vld [vmem:[%s6259_s4 + $0x320] sm:$0xff]  ;;  %v3592_v0 = vld [vmem:[%s6259_s4 + $0x208] sm:$0xff] }
 0x15e   :  { %v1940_v36 = vsel %vm1934_vm12, %v1861_v26, %v1937_v29  ;;  %v1959_v38 = vrot.slane %v1941_v35, %v5633_v1  ;;  %v5923_v35 = vld [vmem:[%s6259_s4 + $0x160] sm:$0xff] }
 0x15f   :  { %v1945_v37 = vcombine.low %v1939_v34, %v1940_v36  ;;  %v5918_v34 = vld [vmem:[%s6260_s2 + $0x1b] sm:$0x7]  ;;  %v5928_v36 = vld [vmem:[%s6259_s4 + $0x168] sm:$0xff]  ;;  %v3635_v3 = vld [vmem:[%s6259_s4 + $0x340] sm:$0xff] }
 0x161   :  { %v1952_v39 = vrot.slane %v1945_v37, %v5633_v1  ;;  %v4503_v37 = vpack.c.bf16 %v3570_v7, %v3569_v6 }
 0x163   :  { %v1960_v41 = vcombine.low %v1952_v39, %v1959_v38  ;;  %v1961_v13 = vcombine.high %v1952_v39, %v1959_v38  ;;  %v4551_v38 = vpack.c.bf16 %v3614_v9, %v3613_v8  ;;  %v4505_v39 = vpack.c.bf16 %v3588_v23, %v5880_v10  ;;  %v3576_v23 = vld [vmem:[%s6259_s4 + $0x188] sm:$0xff] }
 0x165   :  { %v1968_v42 = vrot.slane %v1960_v41, %v5633_v1  ;;  %v1975_v43 = vrot.slane %v1961_v13, %v5633_v1  ;;  %v3616_v41 = vld [vmem:[%s6259_s4 + $0x2a8] sm:$0xff]  ;;  %v5940_v13 = vld [vmem:[%s6259_s4 + $0x1f0] sm:$0xff] }
 0x167   :  { %v1976_v48 = vcombine.high %v1968_v42, %v1968_v42  ;;  %v1977_v49 = vcombine.high %v1975_v43, %v1975_v43  ;;  %1983 = vst.msk [vmem:[#allocation2 + $0x7] ss:$8 sm:$0x7] %vm5674_vm5, %v1968_v42  ;;  %1986 = vst.msk [vmem:[#allocation2 + $0x37] ss:$8 sm:$0x7] %vm5674_vm5, %v1975_v43 }
 0x168   :  { %v2174_v50 = vpop.f32.mrb[16].mxu1  ;;  %v2103_v51 = vpop.f32.mrb[16].mxu0 }
 0x169   :  { %1989 = vst.msk [vmem:[#allocation2 + $0x67] ss:$8 sm:$0x7] %vm5674_vm5, %v1976_v48  ;;  %1992 = vst.msk [vmem:[#allocation2 + $0x97] ss:$8 sm:$0x7] %vm5674_vm5, %v1977_v49  ;;  %v2175_v52 = vadd.f32 %v2174_v50, %v2033_v44  ;;  %v2104_v53 = vadd.f32 %v2103_v51, %v2025_v45  ;;  %v2278_v50 = vrot.slane %v5918_v34, %v5588_v32 }
 0x16a   :  { %v2105_v54 = vpop.f32.mrb[17].mxu0  ;;  %v4083_v55 = vpop.f32.mrb[17].mxu1  ;;  %v3590_v48 = vld [vmem:[%s6259_s4 + $0x1f8] sm:$0xff]  ;;  %v3633_v51 = vld [vmem:[%s6259_s4 + $0x330] sm:$0xff]  ;;  %v2274_v32 = vrot.slane %v5918_v34, %v5590_v33 }
 0x16b   :  { %v2106_v4 = vadd.f32 %v2105_v54, %v2029_v46  ;;  %vm2180_vm13 = vcmp.gt.f32.partialorder %v2175_v52, 0.0  ;;  %v2183_v59 = vmul.f32 %v2175_v52, %v5628_v56  ;;  %vm2178_vm14 = vcmp.gt.f32.partialorder %v2104_v53, 0.0 }
 0x16c   :  { %v2181_v60 = vmul.f32 %v2104_v53, %v5628_v56  ;;  %v4553_v46 = vpack.c.bf16 %v3632_v27, %v3631_v24  ;;  %v2270_v55 = vrot.slane %v5918_v34, %v5586_v31  ;;  %v4507_v31 = vpack.c.bf16 %v5928_v36, %v5923_v35  ;;  %v3619_v27 = vld [vmem:[%s6259_s4 + $0x2c0] sm:$0xff]  ;;  %v3620_v35 = vld [vmem:[%s6259_s4 + $0x2c8] sm:$0xff]  ;;  %v3593_v36 = vld [vmem:[%s6259_s4 + $0x210] sm:$0xff] }
 0x16d   :  { %vm2179_vm15 = vcmp.gt.f32.partialorder %v2106_v4, 0.0  ;;  %v2182_v63 = vmul.f32 %v2106_v4, %v5628_v56  ;;  %v2186_v11 = vsel %vm2180_vm13, %v2175_v52, %v2183_v59  ;;  %v3634_v52 = vld [vmem:[%s6259_s4 + $0x338] sm:$0xff]  ;;  %v4555_v59 = vpack.c.bf16 %v3616_v41, %v3615_v40 }
 0x16e   :  { %v2184_v5 = vsel %vm2178_vm14, %v2104_v53, %v2181_v60  ;;  %v5883_v14 = vld [vmem:[#allocation2 + $0x8] sm:$0xff]  ;;  %v5885_v15 = vld [vmem:[#allocation2 + $0x10] sm:$0xff]  ;;  %v5887_v16 = vld [vmem:[#allocation2] sm:$0xff]  ;;  %v2204_v28 = vrot.slane %v2186_v11, %v5633_v1  ;;  %v4509_v33 = vpack.c.bf16 %v3590_v48, %v5940_v13  ;;  %v4557_v2 = vpack.c.bf16 %v3634_v52, %v3633_v51 }
 0x16f   :  { %v2185_v12 = vsel %vm2179_vm15, %v2106_v4, %v2182_v63  ;;  %2625 = vmatprep.mubr.f32.mxu0 %v5883_v14  ;;  %4119 = vmatprep.mubr.msk.f32.mxu1 %vm69_vm1, %v5885_v15  ;;  %v5892_v20 = vld [vmem:[#allocation2 + $0x40] sm:$0xff]  ;;  %v5903_v25 = vld [vmem:[#allocation2 + $0x38] sm:$0xff]  ;;  %v5942_v44 = vld [vmem:[#allocation2 + $0x30] sm:$0xff] }
 0x170   :  { %v2190_v19 = vcombine.low %v2184_v5, %v2185_v12  ;;  %2626 = vmatmul.mubr.f32.vlgmr.msra.gmra.mrb[20].mxu0 %v5887_v16  ;;  %4120 = vmatmul.mubr.msk.f32.vlgmr.msra.gmra.mrb[20].mxu1 %vm69_vm1, %v5892_v20  ;;  %v5905_v26 = vld [vmem:[#allocation2 + $0x70] sm:$0xff]  ;;  %v5944_v45 = vld [vmem:[#allocation2 + $0xa0] sm:$0xff]  ;;  %v5952_v49 = vld [vmem:[#allocation2 + $0x68] sm:$0xff] }
 0x171   :  { %2630 = vmatprep.mubr.f32.mxu0 %v5903_v25  ;;  %4122 = vmatprep.mubr.msk.f32.mxu1 %vm69_vm1, %v5905_v26  ;;  %v3573_v4 = vld [vmem:[%s6259_s4 + $0x170] sm:$0xff]  ;;  %v3618_v60 = vld [vmem:[%s6259_s4 + $0x2b8] sm:$0xff]  ;;  %v5994_v47 = vld [vmem:[#allocation2 + $0x60] sm:$0xff] }
 0x172   :  { %v2197_v29 = vrot.slane %v2190_v19, %v5633_v1  ;;  %4500 = vmatpush3.bf16.msra.mxu1 %v4499_v17  ;;  %4548 = vmatpush3.bf16.msra.mxu0 %v4547_v18  ;;  %v3636_v5 = vld [vmem:[%s6259_s4 + $0x348] sm:$0xff]  ;;  %v6003_v8 = vld [vmem:[#allocation2 + $0x98] sm:$0xff]  ;;  %v4511_v17 = vpack.c.bf16 %v3574_v57, %v3573_v4  ;;  %v4559_v18 = vpack.c.bf16 %v3618_v60, %v3617_v58  ;;  %v6021_v34 = vld [vmem:[#allocation2 + $0x90] sm:$0xff] }
 0x173   :  { %4502 = vmatprep.subr.bf16.mxu1 %v4501_v21  ;;  %4550 = vmatprep.subr.bf16.mxu0 %v4549_v22  ;;  %v4513_v21 = vpack.c.bf16 %v3592_v0, %v3591_v61  ;;  %v3575_v22 = vld [vmem:[%s6259_s4 + $0x180] sm:$0xff]  ;;  %v4561_v24 = vpack.c.bf16 %v3636_v5, %v3635_v3  ;;  %v3638_v40 = vld [vmem:[%s6259_s4 + $0x358] sm:$0xff]  ;;  %v3640_v57 = vld [vmem:[%s6259_s4 + $0x368] sm:$0xff] }
 0x174   :  { %v2205_v42 = vcombine.low %v2197_v29, %v2204_v28  ;;  %v2206_v43 = vcombine.high %v2197_v29, %v2204_v28  ;;  %2631 = vmatmul.mubr.f32.gmra.mrb[22].mxu0 %v5942_v44  ;;  %4123 = vmatmul.mubr.msk.f32.gmra.mrb[22].mxu1 %vm69_vm1, %v5944_v45  ;;  %v4515_v13 = vpack.c.bf16 %v3576_v23, %v3575_v22  ;;  %v3578_v48 = vld [vmem:[%s6259_s4 + $0x198] sm:$0xff]  ;;  %v3639_v4 = vld [vmem:[%s6259_s4 + $0x360] sm:$0xff]  ;;  %v3580_v0 = vld [vmem:[%s6259_s4 + $0x1a8] sm:$0xff] }
 0x175   :  { %2635 = vmatprep.mubr.f32.mxu0 %v5952_v49  ;;  %v3579_v61 = vld [vmem:[%s6259_s4 + $0x1a0] sm:$0xff]  ;;  %v4569_v3 = vpack.c.bf16 %v3640_v57, %v3639_v4  ;;  %v3624_v5 = vld [vmem:[%s6259_s4 + $0x2e8] sm:$0xff]  ;;  %v3582_v22 = vld [vmem:[%s6259_s4 + $0x1b8] sm:$0xff]  ;;  %v2774_v4 = vrot.slane %v5903_v25, 1 }
 0x176   :  { %v2213_v53 = vrot.slane %v2205_v42, %v5633_v1  ;;  %v2220_v54 = vrot.slane %v2206_v43, %v5633_v1  ;;  %4504 = vmatpush3.bf16.msra.mxu1 %v4503_v37  ;;  %4552 = vmatpush3.bf16.msra.mxu0 %v4551_v38  ;;  %v3594_v38 = vld [vmem:[%s6259_s4 + $0x218] sm:$0xff] }
 0x177   :  { %4506 = vmatprep.subr.bf16.mxu1 %v4505_v39  ;;  %4554 = vmatprep.subr.bf16.mxu0 %v4553_v46  ;;  %v2419_v6 = vpop.f32.mrb[18].mxu1  ;;  %v2348_v7 = vpop.f32.mrb[18].mxu0  ;;  %v3637_v39 = vld [vmem:[%s6259_s4 + $0x350] sm:$0xff]  ;;  %v4517_v52 = vpack.c.bf16 %v3594_v38, %v3593_v36  ;;  %v3643_v36 = vld [vmem:[%s6259_s4 + $0x380] sm:$0xff] }
 0x178   :  { %v2221_v62 = vcombine.high %v2213_v53, %v2213_v53  ;;  %v2222_v63 = vcombine.high %v2220_v54, %v2220_v54  ;;  %2228 = vst.msk [vmem:[#allocation2 + $0x18] ss:$8 sm:$0x7] %vm5674_vm5, %v2213_v53  ;;  %2231 = vst.msk [vmem:[#allocation2 + $0x48] ss:$8 sm:$0x7] %vm5674_vm5, %v2220_v54  ;;  %2636 = vmatmul.mubr.f32.gmra.mrb[24].mxu0 %v5994_v47  ;;  %v2420_v9 = vadd.f32 %v2419_v6, %v2278_v50 }
 0x179   :  { %v2349_v10 = vadd.f32 %v2348_v7, %v2270_v55  ;;  %v2350_v11 = vpop.f32.mrb[19].mxu0  ;;  %2640 = vmatprep.mubr.f32.mxu0 %v6003_v8  ;;  %v4102_v12 = vpop.f32.mrb[19].mxu1  ;;  %v3577_v46 = vld [vmem:[%s6259_s4 + $0x190] sm:$0xff]  ;;  %v4565_v53 = vpack.c.bf16 %v3638_v40, %v3637_v39  ;;  %v3622_v54 = vld [vmem:[%s6259_s4 + $0x2d8] sm:$0xff]  ;;  %v3595_v55 = vld [vmem:[%s6259_s4 + $0x220] sm:$0xff] }
 0x17a   :  { %2234 = vst.msk [vmem:[#allocation2 + $0x78] ss:$8 sm:$0x7] %vm5674_vm5, %v2221_v62  ;;  %2237 = vst.msk [vmem:[#allocation2 + $0xa8] ss:$8 sm:$0x7] %vm5674_vm5, %v2222_v63  ;;  %v2351_v19 = vadd.f32 %v2350_v11, %v2274_v32  ;;  %4508 = vmatpush3.bf16.msra.mxu1 %v4507_v31  ;;  %4556 = vmatpush3.bf16.msra.mxu0 %v4555_v59  ;;  %v2428_v28 = vmul.f32 %v2420_v9, %v5628_v56 }
 0x17b   :  { %vm2425_vm0 = vcmp.gt.f32.partialorder %v2420_v9, 0.0  ;;  %vm2423_vm2 = vcmp.gt.f32.partialorder %v2349_v10, 0.0  ;;  %v2426_v29 = vmul.f32 %v2349_v10, %v5628_v56  ;;  %4510 = vmatprep.subr.bf16.mxu1 %v4509_v33  ;;  %4558 = vmatprep.subr.bf16.mxu0 %v4557_v2  ;;  %v3621_v50 = vld [vmem:[%s6259_s4 + $0x2d0] sm:$0xff]  ;;  %v3596_v32 = vld [vmem:[%s6259_s4 + $0x228] sm:$0xff]  ;;  %v4519_v59 = vpack.c.bf16 %v3578_v48, %v3577_v46  ;;  %v3623_v62 = vld [vmem:[%s6259_s4 + $0x2e0] sm:$0xff] }
 0x17c   :  { %vm2424_vm3 = vcmp.gt.f32.partialorder %v2351_v19, 0.0  ;;  %v2427_v37 = vmul.f32 %v2351_v19, %v5628_v56  ;;  %2641 = vmatmul.mubr.f32.gmra.mrb[26].mxu0 %v6021_v34  ;;  %v2431_v42 = vsel %vm2425_vm0, %v2420_v9, %v2428_v28  ;;  %v4563_v56 = vpack.c.bf16 %v3620_v35, %v3619_v27  ;;  %v3597_v6 = vld [vmem:[%s6259_s4 + $0x230] sm:$0xff]  ;;  %v3598_v7 = vld [vmem:[%s6259_s4 + $0x238] sm:$0xff]  ;;  %v3600_v35 = vld [vmem:[%s6259_s4 + $0x248] sm:$0xff] }
 0x17d   :  { %v2429_v41 = vsel %vm2423_vm2, %v2349_v10, %v2426_v29  ;;  %v2449_v58 = vrot.slane %v2431_v42, %v5633_v1  ;;  %v4567_v33 = vpack.c.bf16 %v3622_v54, %v3621_v50  ;;  %v4521_v60 = vpack.c.bf16 %v3596_v32, %v3595_v55  ;;  %v3641_v9 = vld [vmem:[%s6259_s4 + $0x370] sm:$0xff]  ;;  %v3642_v10 = vld [vmem:[%s6259_s4 + $0x378] sm:$0xff]  ;;  %v3599_v29 = vld [vmem:[%s6259_s4 + $0x240] sm:$0xff] }
 0x17e   :  { %v2430_v43 = vsel %vm2424_vm3, %v2351_v19, %v2427_v37  ;;  %4512 = vmatpush3.bf16.msra.mxu1 %v4511_v17  ;;  %4560 = vmatpush3.bf16.msra.mxu0 %v4559_v18  ;;  %v4523_v17 = vpack.c.bf16 %v3580_v0, %v3579_v61  ;;  %v4571_v18 = vpack.c.bf16 %v3624_v5, %v3623_v62  ;;  %v3625_v27 = vld [vmem:[%s6259_s4 + $0x2f0] sm:$0xff]  ;;  %v3626_v28 = vld [vmem:[%s6259_s4 + $0x2f8] sm:$0xff]  ;;  %v3644_v37 = vld [vmem:[%s6259_s4 + $0x388] sm:$0xff]  ;;  %v2765_v42 = vrot.slane %v5883_v14, 1 }
 0x17f   :  { %v2435_v51 = vcombine.low %v2429_v41, %v2430_v43  ;;  %4514 = vmatprep.subr.bf16.mxu1 %v4513_v21  ;;  %4562 = vmatprep.subr.bf16.mxu0 %v4561_v24  ;;  %v4525_v19 = vpack.c.bf16 %v3598_v7, %v3597_v6  ;;  %v3581_v21 = vld [vmem:[%s6259_s4 + $0x1b0] sm:$0xff]  ;;  %v4575_v39 = vpack.c.bf16 %v3626_v28, %v3625_v27  ;;  %v3033_v43 = vrot.slane %v5883_v14, 2  ;;  %v3646_v50 = vld [vmem:[%s6259_s4 + $0x398] sm:$0xff]  ;;  %v3603_v62 = vld [vmem:[%s6259_s4 + $0x260] sm:$0xff] }
 0x180   :  { %v4527_v38 = vpack.c.bf16 %v3582_v22, %v3581_v21  ;;  %v4529_v40 = vpack.c.bf16 %v3600_v35, %v3599_v29  ;;  %v6125_v41 = vpack.c.bf16 %v3644_v37, %v3643_v36  ;;  %v3030_v46 = vrot.slane %v5887_v16, 2  ;;  %v3645_v48 = vld [vmem:[%s6259_s4 + $0x390] sm:$0xff]  ;;  %v3604_v6 = vld [vmem:[%s6259_s4 + $0x268] sm:$0xff]  ;;  %v3647_v7 = vld [vmem:[%s6259_s4 + $0x3a0] sm:$0xff] }
 0x181   :  { %v2442_v31 = vrot.slane %v2435_v51, %v5633_v1  ;;  %v6153_v5 = vpack.c.bf16 %v3646_v50, %v3645_v48  ;;  %v2783_v22 = vrot.slane %v5952_v49, 1  ;;  %v3649_v36 = vld [vmem:[%s6259_s4 + $0x3b0] sm:$0xff]  ;;  %v3650_v37 = vld [vmem:[%s6259_s4 + $0x3b8] sm:$0xff]  ;;  %v3060_v48 = vrot.slane %v6003_v8, 2 }
 0x182   :  { %4516 = vmatpush3.bf16.msra.mxu1 %v4515_v13  ;;  %4564 = vmatpush3.bf16.msra.mxu0 %v4563_v56  ;;  %v3601_v13 = vld [vmem:[%s6259_s4 + $0x250] sm:$0xff]  ;;  %v2762_v56 = vrot.slane %v5887_v16, 1 }
 0x183   :  { %v2450_v63 = vcombine.low %v2442_v31, %v2449_v58  ;;  %v2451_v2 = vcombine.high %v2442_v31, %v2449_v58  ;;  %4518 = vmatprep.subr.bf16.mxu1 %v4517_v52  ;;  %4566 = vmatprep.subr.bf16.mxu0 %v4565_v53  ;;  %v4533_v31 = vpack.c.bf16 %v3602_v30, %v3601_v13  ;;  %v2780_v13 = vrot.slane %v5994_v47, 1 }
 0x184   :  { %v3048_v30 = vrot.slane %v5994_v47, 2 }
 0x185   :  { %v2458_v11 = vrot.slane %v2450_v63, %v5633_v1  ;;  %v2465_v12 = vrot.slane %v2451_v2, %v5633_v1  ;;  %v4573_v1 = vpack.c.bf16 %v3642_v10, %v3641_v9  ;;  %v3042_v63 = vrot.slane %v5903_v25, 2  ;;  %v3648_v9 = vld [vmem:[%s6259_s4 + $0x3a8] sm:$0xff] }
 0x186   :  { %4520 = vmatpush3.bf16.msra.mxu1 %v4519_v59  ;;  %4568 = vmatpush3.bf16.msra.mxu0 %v4567_v33 }
 0x187   :  { %v2466_v23 = vcombine.high %v2458_v11, %v2458_v11  ;;  %v2467_v24 = vcombine.high %v2465_v12, %v2465_v12  ;;  %2473 = vst.msk [vmem:[#allocation2 + $0x19] ss:$8 sm:$0x7] %vm5674_vm5, %v2458_v11  ;;  %2476 = vst.msk [vmem:[#allocation2 + $0x49] ss:$8 sm:$0x7] %vm5674_vm5, %v2465_v12  ;;  %4522 = vmatprep.subr.bf16.mxu1 %v4521_v60  ;;  %4570 = vmatprep.subr.bf16.mxu0 %v4569_v3 }
 0x188   :  { %v2771_v12 = vrot.slane %v5942_v44, 1 }
 0x189   :  { %2479 = vst.msk [vmem:[#allocation2 + $0x79] ss:$8 sm:$0x7] %vm5674_vm5, %v2466_v23  ;;  %2482 = vst.msk [vmem:[#allocation2 + $0xa9] ss:$8 sm:$0x7] %vm5674_vm5, %v2467_v24  ;;  %v4537_v24 = vpack.c.bf16 %v3604_v6, %v3603_v62 }
 0x18a   :  { %4524 = vmatpush3.bf16.msra.mxu1 %v4523_v17  ;;  %4572 = vmatpush3.bf16.msra.mxu0 %v4571_v18  ;;  %v3039_v17 = vrot.slane %v5942_v44, 2  ;;  %v3051_v23 = vrot.slane %v5952_v49, 2  ;;  %v3605_v44 = vld [vmem:[%s6259_s4 + $0x270] sm:$0xff]  ;;  %v3606_v49 = vld [vmem:[%s6259_s4 + $0x278] sm:$0xff]  ;;  %v2786_v6 = vrot.slane %v5905_v26, 1 }
 0x18b   :  { %4526 = vmatprep.subr.bf16.mxu1 %v4525_v19  ;;  %4574 = vmatprep.subr.bf16.mxu0 %v4573_v1  ;;  %v6171_v1 = vpack.c.bf16 %v3648_v9, %v3647_v7  ;;  %v4541_v50 = vpack.c.bf16 %v3606_v49, %v3605_v44 }
 0x18e   :  { %4528 = vmatpush3.bf16.msra.mxu1 %v4527_v38  ;;  %4576 = vmatpush3.bf16.msra.mxu0 %v4575_v39  ;;  %v2488_v51 = vld [vmem:[#allocation2 + $0x20] sm:$0x3]  ;;  %v2487_v52 = vld [vmem:[#allocation2 + $0x18] sm:$0x3]  ;;  %v2494_v53 = vld [vmem:[#allocation2 + $0x50] sm:$0x3] }
 0x18f   :  { %v2766_v54 = vrot.slane %v2488_v51, 1  ;;  %4530 = vmatprep.subr.bf16.mxu1 %v4529_v40  ;;  %v3034_v14 = vrot.slane %v2488_v51, 2  ;;  %v2763_v55 = vrot.slane %v2487_v52, 1  ;;  %v3031_v32 = vrot.slane %v2487_v52, 2  ;;  %4578 = vmatprep.subr.bf16.mxu0 %v6125_v41  ;;  %v2493_v16 = vld [vmem:[#allocation2 + $0x48] sm:$0x3] }
 0x190   :  { %v2775_v57 = vrot.slane %v2494_v53, 1  ;;  %v3043_v58 = vrot.slane %v2494_v53, 2  ;;  %v2500_v59 = vld [vmem:[#allocation2 + $0x80] sm:$0x3]  ;;  %v2772_v2 = vrot.slane %v2493_v16, 1  ;;  %v3040_v3 = vrot.slane %v2493_v16, 2 }
 0x191   :  { %v2767_v33 = vsel %vm2761_vm4, %v2765_v42, %v2766_v54  ;;  %v3035_v60 = vsel %vm3029_vm6, %v3033_v43, %v3034_v14  ;;  %v2764_v61 = vsel %vm2761_vm4, %v2762_v56, %v2763_v55  ;;  %v3032_v0 = vsel %vm3029_vm6, %v3030_v46, %v3031_v32  ;;  %v2499_v11 = vld [vmem:[#allocation2 + $0x78] sm:$0x3]  ;;  %v2506_v21 = vld [vmem:[#allocation2 + $0xb0] sm:$0x3]  ;;  %v2489_v56 = vld [vmem:[#allocation2 + $0x28] sm:$0x3] }
 0x192   :  { %2919 = vmatprep.mubr.f32.mxu1 %v2767_v33  ;;  %3187 = vmatprep.mubr.f32.mxu0 %v3035_v60  ;;  %v2776_v25 = vsel %vm2761_vm4, %v2774_v4, %v2775_v57  ;;  %v2784_v10 = vrot.slane %v2500_v59, 1  ;;  %v3044_v18 = vsel %vm3029_vm6, %v3042_v63, %v3043_v58  ;;  %v3052_v19 = vrot.slane %v2500_v59, 2  ;;  %v2495_v55 = vld [vmem:[#allocation2 + $0x58] sm:$0x3] }
 0x193   :  { %2920 = vmatmul.mubr.f32.vlgmr.msra.gmra.mrb[24].mxu1 %v2764_v61  ;;  %3188 = vmatmul.mubr.f32.vlgmr.msra.gmra.mrb[28].mxu0 %v3032_v0  ;;  %v2773_v27 = vsel %vm2761_vm4, %v2771_v12, %v2772_v2  ;;  %v3041_v28 = vsel %vm3029_vm6, %v3039_v17, %v3040_v3  ;;  %v2781_v29 = vrot.slane %v2499_v11, 1  ;;  %v3049_v35 = vrot.slane %v2499_v11, 2  ;;  %v2507_v62 = vld [vmem:[#allocation2 + $0xb8] sm:$0x3] }
 0x194   :  { %4532 = vmatpush3.bf16.msra.mxu1 %v4529_v40  ;;  %2924 = vmatprep.mubr.f32.mxu1 %v2776_v25  ;;  %v2785_v38 = vsel %vm2761_vm4, %v2783_v22, %v2784_v10  ;;  %v2793_v39 = vrot.slane %v2506_v21, 1  ;;  %v2505_v40 = vld [vmem:[#allocation2 + $0xa8] sm:$0x3]  ;;  %v3053_v42 = vsel %vm3029_vm6, %v3051_v23, %v3052_v19  ;;  %v3061_v43 = vrot.slane %v2506_v21, 2 }
 0x195   :  { %3192 = vmatprep.mubr.f32.mxu0 %v3044_v18  ;;  %4580 = vmatpush3.bf16.msra.mxu0 %v6125_v41  ;;  %v2792_v46 = vrot.slane %v6003_v8, 1  ;;  %v6195_v51 = vpack.c.bf16 %v3650_v37, %v3649_v36  ;;  %v2782_v52 = vsel %vm2761_vm4, %v2780_v13, %v2781_v29  ;;  %v3050_v47 = vsel %vm3029_vm6, %v3048_v30, %v3049_v35 }
 0x196   :  { %4534 = vmatprep.subr.bf16.mxu1 %v4533_v31  ;;  %4582 = vmatprep.subr.bf16.mxu0 %v6153_v5  ;;  %v2790_v53 = vrot.slane %v2505_v40, 1  ;;  %v3058_v54 = vrot.slane %v2505_v40, 2  ;;  %v2769_v8 = vrot.slane %v2489_v56, 1  ;;  %v2789_v32 = vrot.slane %v6021_v34, 1 }
 0x197   :  { %2925 = vmatmul.mubr.f32.gmra.mrb[26].mxu1 %v2773_v27  ;;  %3193 = vmatmul.mubr.f32.gmra.mrb[30].mxu0 %v3041_v28  ;;  %v2794_v14 = vsel %vm2761_vm4, %v2792_v46, %v2793_v39  ;;  %v3057_v16 = vrot.slane %v6021_v34, 2  ;;  %v3062_v4 = vsel %vm3029_vm6, %v3060_v48, %v3061_v43  ;;  %v3037_v57 = vrot.slane %v2489_v56, 2 }
 0x198   :  { %4536 = vmatpush3.bf16.msra.mxu1 %v4533_v31  ;;  %2929 = vmatprep.mubr.f32.mxu1 %v2785_v38  ;;  %v2768_v58 = vrot.slane %v5885_v15, 1  ;;  %v2501_v31 = vld [vmem:[#allocation2 + $0x88] sm:$0x3]  ;;  %v3036_v59 = vrot.slane %v5885_v15, 2  ;;  %v2791_v33 = vsel %vm2761_vm4, %v2789_v32, %v2790_v53  ;;  %v2778_v34 = vrot.slane %v2495_v55, 1 }
 0x199   :  { %3197 = vmatprep.mubr.f32.mxu0 %v3053_v42  ;;  %4584 = vmatpush3.bf16.msra.mxu0 %v6153_v5  ;;  %v3059_v60 = vsel %vm3029_vm6, %v3057_v16, %v3058_v54  ;;  %v3046_v0 = vrot.slane %v2495_v55, 2  ;;  %v2777_v63 = vrot.slane %v5892_v20, 1  ;;  %v2787_v2 = vrot.slane %v2501_v31, 1 }
 0x19a   :  { %4538 = vmatprep.subr.bf16.mxu1 %v4537_v24  ;;  %4586 = vmatprep.subr.bf16.mxu0 %v6171_v1  ;;  %v2770_v61 = vsel %vm2761_vm4, %v2768_v58, %v2769_v8  ;;  %v3038_v15 = vsel %vm3029_vm6, %v3036_v59, %v3037_v57  ;;  %v3045_v3 = vrot.slane %v5892_v20, 2  ;;  %v2796_v9 = vrot.slane %v2507_v62, 1 }
 0x19b   :  { %2930 = vmatmul.mubr.f32.gmra.mrb[28].mxu1 %v2782_v52  ;;  %3198 = vmatmul.mubr.f32.gmra.mrb[32].mxu0 %v3050_v47  ;;  %v2779_v7 = vsel %vm2761_vm4, %v2777_v63, %v2778_v34  ;;  %v3055_v10 = vrot.slane %v2501_v31, 2  ;;  %v2795_v11 = vrot.slane %v5944_v45, 1  ;;  %v2788_v20 = vsel %vm2761_vm4, %v2786_v6, %v2787_v2 }
 0x19c   :  { %4540 = vmatpush3.bf16.msra.mxu1 %v4537_v24  ;;  %2934 = vmatprep.mubr.f32.mxu1 %v2794_v14  ;;  %v3047_v25 = vsel %vm3029_vm6, %v3045_v3, %v3046_v0  ;;  %v3054_v12 = vrot.slane %v5905_v26, 2  ;;  %v3064_v26 = vrot.slane %v2507_v62, 2 }
 0x19d   :  { %3202 = vmatprep.mubr.f32.mxu0 %v3062_v4  ;;  %4588 = vmatpush3.bf16.msra.mxu0 %v6171_v1  ;;  %v2797_v17 = vsel %vm2761_vm4, %v2795_v11, %v2796_v9 }
 0x19e   :  { %4542 = vmatprep.subr.bf16.mxu1 %v4541_v50  ;;  %4590 = vmatprep.subr.bf16.mxu0 %v6195_v51  ;;  %v3056_v18 = vsel %vm3029_vm6, %v3054_v12, %v3055_v10 }
 0x19f   :  { %2935 = vmatmul.mubr.f32.gmra.mrb[30].mxu1 %v2791_v33  ;;  %3203 = vmatmul.mubr.f32.gmra.mrb[34].mxu0 %v3059_v60 }
 0x1a0   :  { %4544 = vmatpush3.bf16.msra.mxu1 %v4541_v50  ;;  %4141 = vmatprep.mubr.msk.f32.mxu1 %vm69_vm1, %v2770_v61 }
 0x1a1   :  { %4592 = vmatpush3.bf16.msra.mxu0 %v6195_v51  ;;  %4163 = vmatprep.mubr.msk.f32.mxu0 %vm69_vm1, %v3038_v15 }
 0x1a2   :  { %4593 = vmatprep.subr.bf16.mxu1 %v6125_v41 }
 0x1a3   :  { %4142 = vmatmul.mubr.msk.f32.vlgmr.msra.gmra.mrb[20].mxu1 %vm69_vm1, %v2779_v7 }
 0x1a4   :  { %4597 = vmatpush3.bf16.msra.mxu1 %v6125_v41  ;;  %4164 = vmatmul.mubr.msk.f32.vlgmr.msra.gmra.mrb[36].mxu0 %vm69_vm1, %v3047_v25  ;;  %v3063_v41 = vrot.slane %v5944_v45, 2  ;;  %v3566_v45 = vld [vmem:[%s6261_s5] ss:$0 sm:$0xff] }
 0x1a5   :  { %4144 = vmatprep.mubr.msk.f32.mxu1 %vm69_vm1, %v2788_v20  ;;  %4594 = vmatprep.subr.bf16.mxu1 %v6153_v5 }
 0x1a6   :  { %v3065_v19 = vsel %vm3029_vm6, %v3063_v41, %v3064_v26 }
 0x1a7   :  { %4145 = vmatmul.mubr.msk.f32.gmra.mrb[22].mxu1 %vm69_vm1, %v2797_v17 }
 0x1a8   :  { %4598 = vmatpush3.bf16.msra.mxu1 %v6153_v5  ;;  %4166 = vmatprep.mubr.msk.f32.mxu1 %vm69_vm1, %v3056_v18 }
 0x1a9   :  { %4595 = vmatprep.subr.bf16.mxu1 %v6171_v1 }
 0x1ac   :  { %4599 = vmatpush3.bf16.msra.mxu1 %v6171_v1 }
 0x1ad   :  { %4596 = vmatprep.subr.bf16.mxu1 %v6195_v51 }
 0x1b0   :  { %4600 = vmatpush3.bf16.msra.mxu1 %v6195_v51 }
 0x1b3   :  { %4167 = vmatmul.mubr.msk.f32.vlgmr.msra.gmra.mrb[22].mxu1 %vm69_vm1, %v3065_v19 }
 0x243   :  { %v3777_v21 = vpop.f32.mrb[20].mxu0 }
 0x244   :  { %v3778_v22 = vpop.f32.mrb[21].mxu0 }
 0x245   :  { %v3779_v5 = vadd.f32 %v3778_v22, %v3777_v21 }
 0x247   :  { %v3780_v23 = vpop.f32.mrb[22].mxu0  ;;  %v4606_v40 = vadd.f32 %v3779_v5, %v3566_v45 }
 0x248   :  { %v3781_v24 = vpop.f32.mrb[23].mxu0 }
 0x249   :  { %v3782_v44 = vadd.f32 %v3781_v24, %v3780_v23 }
 0x24b   :  { %v3783_v27 = vpop.f32.mrb[24].mxu0  ;;  %v4601_v50 = vadd.f32 %v3782_v44, %v3566_v45 }
 0x24c   :  { %v3784_v28 = vpop.f32.mrb[25].mxu0 }
 0x24d   :  { %v3785_v1 = vadd.f32 %v3784_v28, %v3783_v27 }
 0x24f   :  { %v3786_v29 = vpop.f32.mrb[26].mxu0  ;;  %v4615_v55 = vadd.f32 %v3785_v1, %v3566_v45 }
 0x250   :  { %v3787_v35 = vpop.f32.mrb[27].mxu0 }
 0x251   :  { %v3788_v49 = vadd.f32 %v3787_v35, %v3786_v29 }
 0x253   :  { %v4611_v33 = vadd.f32 %v3788_v49, %v3566_v45 }
 0x266   :  { %v3833_v36 = vpop.f32.mrb[24].mxu1  ;;  %v3889_v37 = vpop.f32.mrb[28].mxu0 }
 0x267   :  { %v3834_v38 = vpop.f32.mrb[25].mxu1  ;;  %v3890_v39 = vpop.f32.mrb[29].mxu0 }
 0x268   :  { %v3835_v13 = vadd.f32 %v3834_v38, %v3833_v36  ;;  %v3891_v30 = vadd.f32 %v3890_v39, %v3889_v37 }
 0x26a   :  { %v3836_v42 = vpop.f32.mrb[26].mxu1  ;;  %v3892_v43 = vpop.f32.mrb[30].mxu0  ;;  %v4607_v56 = vadd.f32 %v4606_v40, %v3835_v13 }
 0x26b   :  { %v3837_v46 = vpop.f32.mrb[27].mxu1  ;;  %v3893_v48 = vpop.f32.mrb[31].mxu0 }
 0x26c   :  { %v3838_v51 = vadd.f32 %v3837_v46, %v3836_v42  ;;  %v3894_v52 = vadd.f32 %v3893_v48, %v3892_v43 }
 0x26e   :  { %v3839_v47 = vpop.f32.mrb[28].mxu1  ;;  %v3895_v53 = vpop.f32.mrb[32].mxu0  ;;  %v4602_v54 = vadd.f32 %v4601_v50, %v3838_v51 }
 0x26f   :  { %v3840_v14 = vpop.f32.mrb[29].mxu1  ;;  %v3896_v8 = vpop.f32.mrb[33].mxu0 }
 0x270   :  { %v3841_v32 = vadd.f32 %v3840_v14, %v3839_v47  ;;  %v3897_v16 = vadd.f32 %v3896_v8, %v3895_v53 }
 0x272   :  { %v4616_v4 = vadd.f32 %v4615_v55, %v3841_v32  ;;  %v3842_v57 = vpop.f32.mrb[30].mxu1  ;;  %v3898_v58 = vpop.f32.mrb[34].mxu0 }
 0x273   :  { %v3843_v31 = vpop.f32.mrb[31].mxu1  ;;  %v3899_v59 = vpop.f32.mrb[35].mxu0 }
 0x274   :  { %v3844_v60 = vadd.f32 %v3843_v31, %v3842_v57  ;;  %v3900_v34 = vadd.f32 %v3899_v59, %v3898_v58  ;;  %v4617_v61 = vadd.f32 %v4616_v4, %v3897_v16 }
 0x276   :  { %v4612_v0 = vadd.f32 %v4611_v33, %v3844_v60  ;;  %v4143_v62 = vpop.f32.mrb[20].mxu1 }
 0x277   :  { %v4603_v63 = vadd.f32 %v4602_v54, %v4143_v62  ;;  %v4165_v15 = vpop.f32.mrb[36].mxu0  ;;  %v3006_v2 = vpop.f32.mrb[21].mxu1 }
 0x278   :  { %v4608_v3 = vadd.f32 %v4607_v56, %v3006_v2  ;;  %v3274_v6 = vpop.f32.mrb[37].mxu0  ;;  %v4613_v7 = vadd.f32 %v4612_v0, %v3900_v34 }
 0x279   :  { %v4604_v9 = vadd.f32 %v4603_v63, %v3894_v52 }
 0x27a   :  { %v4609_v25 = vadd.f32 %v4608_v3, %v3891_v30 }
 0x27b   :  { %v4605_v10 = vadd.f32 %v4604_v9, %v4165_v15 }
 0x27c   :  { %v4610_v11 = vadd.f32 %v4609_v25, %v3274_v6 }
 0x27d   :  { %4631 = vtanh.f32 %v4605_v10 }
 0x27e   :  { %4633 = vtanh.f32 %v4610_v11 }
 0x286   :  { %v4168_v20 = vpop.f32.mrb[22].mxu1 }
 0x287   :  { %v4632_v12 = vpop.eup %4631  ;;  %v4614_v17 = vadd.f32 %v4613_v7, %v4168_v20  ;;  %v3284_v18 = vpop.f32.mrb[23].mxu1 }
 0x288   :  { %v4634_v26 = vpop.eup %4633  ;;  %v3302_v41 = vadd.f32 1.0, %v4632_v12  ;;  %v4618_v19 = vadd.f32 %v4617_v61, %v3284_v18 }
 0x289   :  { %v3301_v21 = vadd.f32 1.0, %v4634_v26  ;;  %4635 = vtanh.f32 %v4614_v17 }
 0x28a   :  { %v3306_v22 = vmul.f32 0.5, %v3302_v41  ;;  %4637 = vtanh.f32 %v4618_v19 }
 0x28b   :  { %v3305_v5 = vmul.f32 0.5, %v3301_v21 }
 0x28c   :  { %3310 = vst [vmem:[%s6262_s6 + $0x8] sm:$0xff] %v3306_v22 }
 0x28d   :  { %3309 = vst [vmem:[%s6262_s6] sm:$0xff] %v3305_v5 }
 0x293   :  { %v4636_v23 = vpop.eup %4635 }
 0x294   :  { %v4638_v24 = vpop.eup %4637  ;;  %v3304_v44 = vadd.f32 1.0, %v4636_v23 }
 0x295   :  { %v3303_v27 = vadd.f32 1.0, %v4638_v24 }
 0x296   :  { %v3308_v28 = vmul.f32 0.5, %v3304_v44 }
 0x297   :  { %v3307_v1 = vmul.f32 0.5, %v3303_v27 }
 0x298   :  { %3312 = vst [vmem:[%s6262_s6 + $0x18] sm:$0xff] %v3308_v28 }
 0x299   :  { %3311 = vst [vmem:[%s6262_s6 + $0x10] sm:$0xff] %v3307_v1 }

</bundles_post_ra>
